<compile_context>
chip_gen: v6e
topology: v6e:2x2x1
jax: 0.10.0
libtpu: 0.0.40
codegen_flags: <defaults>
</compile_context>

<pallas_src>
import math
import functools

import jax
import jax.numpy as jnp
import numpy as np
from jax import lax
from jax.experimental import pallas as pl
from jax.experimental.pallas import tpu as pltpu


# ----------------------------------------------------------------------------
# Pallas kernel.  grid = (S // q_tile, batch, num_heads // G), qi outermost so
# the (Tq, S, D) relative-position tile is streamed from HBM once per qi and
# reused (revisited) across every (batch, head-group) step.
# ----------------------------------------------------------------------------
def _nezha_attn_kernel(q_ref, k_ref, v_ref, rel_ref, mask_ref, ctx_ref,
                       *maybe_probs, heads_per_step, scale, out_probs):
    probs_ref = maybe_probs[0] if out_probs else None

    # Relative-position tile, shared by every head in this step.
    relf = rel_ref[...].astype(jnp.float32)                   # (Tq, S, D)
    m = mask_ref[0, 0]                                        # (1, S) additive

    outs = []
    for g in range(heads_per_step):                           # tiny static unroll
        q = q_ref[0, 0, g]                                    # (Tq, D)
        k = k_ref[0, 0, g]                                    # (S, D)
        v = v_ref[0, 0, g]                                    # (S, D)

        # content scores Q K^T (MXU; contract head_dim of both operands, no .T)
        scores = lax.dot_general(q, k, (((1,), (1,)), ((), ())),
                                 preferred_element_type=jnp.float32)  # (Tq, S)

        # relative-key scores: rel_k[i, j] = sum_d q[i, d] * rel[i, j, d]
        # (f32 VPU broadcast-multiply + lane reduce; robust lowering)
        qf = q.astype(jnp.float32)
        rel_k = jnp.sum(qf[:, None, :] * relf, axis=-1)       # (Tq, S)

        scores = (scores + rel_k) * scale + m

        # numerically-stable, EXACT softmax over the key axis (f32)
        scores = scores - jnp.max(scores, axis=-1, keepdims=True)
        e = jnp.exp(scores)
        p = e / jnp.sum(e, axis=-1, keepdims=True)            # (Tq, S)
        # TODO(synk): attention-prob dropout / head_mask omitted (eval-mode identity).

        pc = p.astype(v.dtype)
        # context: P V (MXU)
        ctx = lax.dot_general(pc, v, (((1,), (0,)), ((), ())),
                              preferred_element_type=jnp.float32)     # (Tq, D)
        # relative-value scores: rel_v[i, d] = sum_j p[i, j] * rel[i, j, d]
        rel_v = jnp.sum(p[:, :, None] * relf, axis=1)                 # (Tq, D)

        outs.append((ctx + rel_v).astype(ctx_ref.dtype))
        if out_probs:
            probs_ref[0, 0, g] = p.astype(probs_ref.dtype)

    # one lane-dense store of the full (Tq, G*D) context slab per step
    ctx_ref[0] = outs[0] if heads_per_step == 1 else jnp.concatenate(outs, axis=-1)


# ----------------------------------------------------------------------------
# Head-group size: largest G dividing num_heads such that the per-step context
# slab (G*D lanes) is a multiple of 128 (lane-dense stores / legal BlockSpec);
# otherwise fall back to G = num_heads (slab == full hidden width).
# ----------------------------------------------------------------------------
def _heads_per_step(num_heads, head_dim):
    if 128 % head_dim == 0:
        g = math.gcd(num_heads, 128 // head_dim)
        if (g * head_dim) % 128 == 0:
            return g
    return num_heads


def _default_vmem_limit(tq, S, D, G, compute_dtype, out_dtype, probs_dtype,
                        output_attentions):
    c = jnp.dtype(compute_dtype).itemsize
    buffers = 2 * tq * S * D * c                         # rel (double-buffered)
    buffers += 2 * G * (tq + 2 * S) * D * c              # q, k, v blocks
    buffers += 2 * tq * G * D * jnp.dtype(out_dtype).itemsize
    if output_attentions:
        buffers += 2 * G * tq * S * jnp.dtype(probs_dtype).itemsize
    temps = tq * S * D * 4 + 6 * tq * S * 4              # f32 rel product + scores
    est = int((buffers + temps) * 1.5)
    # NOTE: on v7x (64 MiB VMEM) keep q_tile small / use bf16 so est stays
    # well under ~56 MiB; on v5e/v6e larger q_tile + a bigger limit is better.
    return max(16 * 1024 * 1024, min(est, 96 * 1024 * 1024))


# ----------------------------------------------------------------------------
# Wrapper.
# ----------------------------------------------------------------------------
def nezha_self_attention(hidden_states, params, rel_enc, attention_mask,
                         num_heads, *, q_tile=None, heads_per_step=None,
                         compute_dtype=jnp.float32, probs_dtype=jnp.float32,
                         output_attentions=True, vmem_limit_bytes=None):
    B, S, H = hidden_states.shape
    D = H // num_heads
    tq = S if q_tile is None else q_tile
    assert S % tq == 0, "q_tile must divide the sequence length"
    G = _heads_per_step(num_heads, D) if heads_per_step is None else heads_per_step
    assert num_heads % G == 0
    NHG = num_heads // G

    # QKV projection hoisted out of the kernel (plain XLA MXU matmuls).
    def proj(w, b):
        y = hidden_states @ w.T + b
        return (y.reshape(B, S, num_heads, D).transpose(0, 2, 1, 3)
                 .reshape(B, NHG, G, S, D).astype(compute_dtype))

    q = proj(params["wq"], params["bq"])
    k = proj(params["wk"], params["bk"])
    v = proj(params["wv"], params["bv"])

    rel = rel_enc.astype(compute_dtype)                       # dense (S, S, D)
    if attention_mask is None:
        attention_mask = jnp.zeros((B, 1, 1, S), jnp.float32)
    mask = attention_mask.astype(jnp.float32)

    grid = (S // tq, B, NHG)        # qi outermost: rel tile fetched once per qi
    in_specs = [
        pl.BlockSpec((1, 1, G, tq, D), lambda qi, b, hg: (b, hg, 0, qi, 0)),  # Q
        pl.BlockSpec((1, 1, G, S, D),  lambda qi, b, hg: (b, hg, 0, 0, 0)),   # K
        pl.BlockSpec((1, 1, G, S, D),  lambda qi, b, hg: (b, hg, 0, 0, 0)),   # V
        pl.BlockSpec((tq, S, D),       lambda qi, b, hg: (qi, 0, 0)),         # rel
        pl.BlockSpec((1, 1, 1, S),     lambda qi, b, hg: (b, 0, 0, 0)),       # mask
    ]
    ctx_spec = pl.BlockSpec((1, tq, G * D), lambda qi, b, hg: (b, qi, hg))
    ctx_shape = jax.ShapeDtypeStruct((B, S, H), hidden_states.dtype)
    if output_attentions:
        out_specs = (ctx_spec,
                     pl.BlockSpec((1, 1, G, tq, S),
                                  lambda qi, b, hg: (b, hg, 0, qi, 0)))
        out_shape = (ctx_shape,
                     jax.ShapeDtypeStruct((B, NHG, G, S, S), probs_dtype))
    else:
        out_specs = ctx_spec
        out_shape = ctx_shape

    if vmem_limit_bytes is None:
        vmem_limit_bytes = _default_vmem_limit(
            tq, S, D, G, compute_dtype, hidden_states.dtype, probs_dtype,
            output_attentions)

    kernel = functools.partial(
        _nezha_attn_kernel, heads_per_step=G, scale=1.0 / math.sqrt(D),
        out_probs=output_attentions)

    outs = pl.pallas_call(
        kernel,
        grid=grid,
        in_specs=in_specs,
        out_specs=out_specs,
        out_shape=out_shape,
        compiler_params=pltpu.CompilerParams(
            dimension_semantics=("arbitrary", "parallel", "parallel"),
            vmem_limit_bytes=vmem_limit_bytes),
    )(q, k, v, rel, mask)

    if output_attentions:
        ctx, probs = outs
        return ctx, probs.reshape(B, num_heads, S, S)
    return (outs,)


# ----------------------------------------------------------------------------
# Relative-position sinusoidal table (matches RelativePositionsEncoding).
# ----------------------------------------------------------------------------
def relative_positions_encoding(length, depth, max_relative_position=64):
    vocab_size = 2 * max_relative_position + 1
    position = jnp.arange(vocab_size, dtype=jnp.float32)[:, None]
    div_term = jnp.exp(jnp.arange(0, depth, 2, dtype=jnp.float32)
                       * (-math.log(10000.0) / depth))
    sin_part = jnp.sin(position * div_term)                  # (vocab, depth//2)
    cos_part = jnp.cos(position * div_term)                  # (vocab, depth//2)
    table = jnp.stack([sin_part, cos_part], axis=-1).reshape(vocab_size, depth)
    idx = jnp.arange(length)
    distance = idx[None, :] - idx[:, None]                   # j - i
    distance = jnp.clip(distance, -max_relative_position, max_relative_position)
    final = distance + max_relative_position
    return table[final]                                      # (length, length, depth)


# ----------------------------------------------------------------------------
# Pure-JAX reference for verification.
# ----------------------------------------------------------------------------
def reference(hidden_states, params, rel, mask, num_heads):
    B, S, H = hidden_states.shape
    D = H // num_heads
    q = hidden_states @ params["wq"].T + params["bq"]
    k = hidden_states @ params["wk"].T + params["bk"]
    v = hidden_states @ params["wv"].T + params["bv"]

    def split(x):
        return x.reshape(B, S, num_heads, D).transpose(0, 2, 1, 3)

    q, k, v = split(q), split(k), split(v)
    scores = jnp.einsum("bnid,bnjd->bnij", q, k)
    rel_k = jnp.einsum("bnid,ijd->bnij", q, rel)
    scores = (scores + rel_k) / math.sqrt(D) + mask
    probs = jax.nn.softmax(scores, axis=-1)
    ctx = jnp.einsum("bnij,bnjd->bnid", probs, v)
    rel_v = jnp.einsum("bnij,ijd->bnid", probs, rel)
    ctx = (ctx + rel_v).transpose(0, 2, 1, 3).reshape(B, S, H)
    return ctx, probs


if __name__ == "__main__":
    B, S, H, NH = 2, 16, 32, 4
    D = H // NH

    key = jax.random.PRNGKey(0)
    keys = jax.random.split(key, 7)
    params = {
        "wq": 0.02 * jax.random.normal(keys[0], (H, H), jnp.float32),
        "bq": 0.02 * jax.random.normal(keys[1], (H,), jnp.float32),
        "wk": 0.02 * jax.random.normal(keys[2], (H, H), jnp.float32),
        "bk": 0.02 * jax.random.normal(keys[3], (H,), jnp.float32),
        "wv": 0.02 * jax.random.normal(keys[4], (H, H), jnp.float32),
        "bv": 0.02 * jax.random.normal(keys[5], (H,), jnp.float32),
    }
    hidden_states = jax.random.normal(keys[6], (B, S, H), jnp.float32)

    # extended additive attention mask [B, 1, 1, S]: batch 0 fully visible,
    # batch 1 has its last two key positions masked.
    mask_np = np.zeros((B, 1, 1, S), np.float32)
    mask_np[1, 0, 0, -2:] = -10000.0
    attention_mask = jnp.asarray(mask_np)

    rel_enc = relative_positions_encoding(S, D, max_relative_position=64)

    # q_tile < S exercises the query-tile grid axis and the rel-tile revisit.
    # (On v6e/v7x pass compute_dtype=jnp.bfloat16 / probs_dtype=jnp.bfloat16.)
    ctx, probs = nezha_self_attention(
        hidden_states, params, rel_enc, attention_mask, NH,
        q_tile=8, compute_dtype=jnp.float32, output_attentions=True)
    jax.block_until_ready((ctx, probs))

    ctx_exp, probs_exp = reference(hidden_states, params, rel_enc,
                                   attention_mask, NH)
    np.testing.assert_allclose(np.asarray(ctx), np.asarray(ctx_exp),
                               rtol=5e-3, atol=5e-3)
    np.testing.assert_allclose(np.asarray(probs), np.asarray(probs_exp),
                               rtol=5e-3, atol=5e-3)
    print("KERNEL_OK")
</pallas_src>

<mosaic_0001>
module attributes {stable_mosaic.version = 11 : i64} {
  func.func @_nezha_attn_kernel(%arg0: i32, %arg1: i32, %arg2: i32, %arg3: memref<1x1x4x8x8xf32, #tpu.memory_space<vmem>>, %arg4: memref<1x1x4x16x8xf32, #tpu.memory_space<vmem>>, %arg5: memref<1x1x4x16x8xf32, #tpu.memory_space<vmem>>, %arg6: memref<8x16x8xf32, #tpu.memory_space<vmem>>, %arg7: memref<1x1x1x16xf32, #tpu.memory_space<vmem>>, %arg8: memref<1x8x32xf32, #tpu.memory_space<vmem>>, %arg9: memref<1x1x4x8x16xf32, #tpu.memory_space<vmem>>) attributes {dimension_semantics = [#tpu.dimension_semantics<arbitrary>, #tpu.dimension_semantics<parallel>, #tpu.dimension_semantics<parallel>], iteration_bounds = array<i64: 2, 2, 1>, scalar_prefetch = 0 : i64, scratch_operands = 0 : i64, tpu.core_type = #tpu.core_type<tc>, window_params = [{transform_indices = @transform_0, window_bounds = array<i64: 1, 1, 4, 8, 8>}, {transform_indices = @transform_1, window_bounds = array<i64: 1, 1, 4, 16, 8>}, {transform_indices = @transform_2, window_bounds = array<i64: 1, 1, 4, 16, 8>}, {transform_indices = @transform_3, window_bounds = array<i64: 8, 16, 8>}, {transform_indices = @transform_4, window_bounds = array<i64: 1, 1, 1, 16>}, {transform_indices = @transform_5, window_bounds = array<i64: 1, 8, 32>}, {transform_indices = @transform_6, window_bounds = array<i64: 1, 1, 4, 8, 16>}]} {
    %c0 = arith.constant 0 : index
    %c0_0 = arith.constant 0 : index
    %c0_1 = arith.constant 0 : index
    %0 = vector.load %arg6[%c0, %c0_0, %c0_1] : memref<8x16x8xf32, #tpu.memory_space<vmem>>, vector<8x16x8xf32>
    %c0_2 = arith.constant 0 : index
    %c0_3 = arith.constant 0 : index
    %c0_4 = arith.constant 0 : index
    %c0_5 = arith.constant 0 : index
    %1 = vector.load %arg7[%c0_2, %c0_3, %c0_4, %c0_5] : memref<1x1x1x16xf32, #tpu.memory_space<vmem>>, vector<1x1x1x16xf32>
    %2 = vector.shape_cast %1 : vector<1x1x1x16xf32> to vector<1x16xf32>
    %c0_6 = arith.constant 0 : index
    %c0_7 = arith.constant 0 : index
    %c0_8 = arith.constant 0 : index
    %c0_9 = arith.constant 0 : index
    %c0_10 = arith.constant 0 : index
    %3 = vector.load %arg3[%c0_6, %c0_7, %c0_8, %c0_9, %c0_10] : memref<1x1x4x8x8xf32, #tpu.memory_space<vmem>>, vector<1x1x1x8x8xf32>
    %4 = vector.shape_cast %3 : vector<1x1x1x8x8xf32> to vector<8x8xf32>
    %c0_11 = arith.constant 0 : index
    %c0_12 = arith.constant 0 : index
    %c0_13 = arith.constant 0 : index
    %c0_14 = arith.constant 0 : index
    %c0_15 = arith.constant 0 : index
    %5 = vector.load %arg4[%c0_11, %c0_12, %c0_13, %c0_14, %c0_15] : memref<1x1x4x16x8xf32, #tpu.memory_space<vmem>>, vector<1x1x1x16x8xf32>
    %6 = vector.shape_cast %5 : vector<1x1x1x16x8xf32> to vector<16x8xf32>
    %c0_16 = arith.constant 0 : index
    %c0_17 = arith.constant 0 : index
    %c0_18 = arith.constant 0 : index
    %c0_19 = arith.constant 0 : index
    %c0_20 = arith.constant 0 : index
    %7 = vector.load %arg5[%c0_16, %c0_17, %c0_18, %c0_19, %c0_20] : memref<1x1x4x16x8xf32, #tpu.memory_space<vmem>>, vector<1x1x1x16x8xf32>
    %8 = vector.shape_cast %7 : vector<1x1x1x16x8xf32> to vector<16x8xf32>
    %cst = arith.constant dense<0.000000e+00> : vector<8x16xf32>
    %9 = tpu.matmul %4, %6, %cst {dimension_numbers = #tpu.dot_dimension_numbers<[1], [1], [0], [0], [0, 0, 1, 0], [], []>} : vector<8x8xf32>, vector<16x8xf32>, vector<8x16xf32> -> vector<8x16xf32>
    %10 = vector.shape_cast %4 : vector<8x8xf32> to vector<8x1x8xf32>
    %11 = vector.broadcast %10 : vector<8x1x8xf32> to vector<8x16x8xf32>
    %12 = arith.mulf %11, %0 : vector<8x16x8xf32>
    %cst_21 = arith.constant dense<0.000000e+00> : vector<8x16xf32>
    %13 = vector.multi_reduction <add>, %12, %cst_21 [2] : vector<8x16x8xf32> to vector<8x16xf32>
    %14 = arith.addf %9, %13 : vector<8x16xf32>
    %cst_22 = arith.constant 0.353553385 : f32
    %15 = vector.broadcast %cst_22 : f32 to vector<8x16xf32>
    %16 = arith.mulf %14, %15 : vector<8x16xf32>
    %17 = vector.broadcast %2 : vector<1x16xf32> to vector<8x16xf32>
    %18 = arith.addf %16, %17 : vector<8x16xf32>
    %cst_23 = arith.constant dense<0xFF800000> : vector<8xf32>
    %19 = vector.multi_reduction <maximumf>, %18, %cst_23 [1] : vector<8x16xf32> to vector<8xf32>
    %20 = vector.shape_cast %19 : vector<8xf32> to vector<8x1xf32>
    %21 = vector.broadcast %20 : vector<8x1xf32> to vector<8x16xf32>
    %22 = arith.subf %18, %21 : vector<8x16xf32>
    %23 = math.exp %22 : vector<8x16xf32>
    %cst_24 = arith.constant dense<0.000000e+00> : vector<8xf32>
    %24 = vector.multi_reduction <add>, %23, %cst_24 [1] : vector<8x16xf32> to vector<8xf32>
    %25 = vector.shape_cast %24 : vector<8xf32> to vector<8x1xf32>
    %26 = vector.broadcast %25 : vector<8x1xf32> to vector<8x16xf32>
    %27 = arith.divf %23, %26 : vector<8x16xf32>
    %cst_25 = arith.constant dense<0.000000e+00> : vector<8x8xf32>
    %28 = tpu.matmul %27, %8, %cst_25 {dimension_numbers = #tpu.dot_dimension_numbers<[1], [0], [0], [1], [0, 0, 1, 1], [], []>} : vector<8x16xf32>, vector<16x8xf32>, vector<8x8xf32> -> vector<8x8xf32>
    %29 = vector.shape_cast %27 : vector<8x16xf32> to vector<8x16x1xf32>
    %30 = vector.broadcast %29 : vector<8x16x1xf32> to vector<8x16x8xf32>
    %31 = arith.mulf %30, %0 : vector<8x16x8xf32>
    %cst_26 = arith.constant dense<0.000000e+00> : vector<8x8xf32>
    %32 = vector.multi_reduction <add>, %31, %cst_26 [1] : vector<8x16x8xf32> to vector<8x8xf32>
    %33 = arith.addf %28, %32 : vector<8x8xf32>
    %c0_27 = arith.constant 0 : index
    %c0_28 = arith.constant 0 : index
    %c0_29 = arith.constant 0 : index
    %c0_30 = arith.constant 0 : index
    %c0_31 = arith.constant 0 : index
    %34 = vector.load %arg9[%c0_27, %c0_28, %c0_29, %c0_30, %c0_31] : memref<1x1x4x8x16xf32, #tpu.memory_space<vmem>>, vector<1x1x1x8x16xf32>
    %35 = vector.shape_cast %34 : vector<1x1x1x8x16xf32> to vector<8x16xf32>
    %36 = vector.shape_cast %27 : vector<8x16xf32> to vector<1x1x1x8x16xf32>
    tpu.vector_store %arg9[%c0_27, %c0_28, %c0_29, %c0_30, %c0_31], %36 {strides = array<i32>} : memref<1x1x4x8x16xf32, #tpu.memory_space<vmem>>, vector<1x1x1x8x16xf32>,
    %c0_32 = arith.constant 0 : index
    %c0_33 = arith.constant 0 : index
    %c1 = arith.constant 1 : index
    %c0_34 = arith.constant 0 : index
    %c0_35 = arith.constant 0 : index
    %37 = vector.load %arg3[%c0_32, %c0_33, %c1, %c0_34, %c0_35] : memref<1x1x4x8x8xf32, #tpu.memory_space<vmem>>, vector<1x1x1x8x8xf32>
    %38 = vector.shape_cast %37 : vector<1x1x1x8x8xf32> to vector<8x8xf32>
    %c0_36 = arith.constant 0 : index
    %c0_37 = arith.constant 0 : index
    %c1_38 = arith.constant 1 : index
    %c0_39 = arith.constant 0 : index
    %c0_40 = arith.constant 0 : index
    %39 = vector.load %arg4[%c0_36, %c0_37, %c1_38, %c0_39, %c0_40] : memref<1x1x4x16x8xf32, #tpu.memory_space<vmem>>, vector<1x1x1x16x8xf32>
    %40 = vector.shape_cast %39 : vector<1x1x1x16x8xf32> to vector<16x8xf32>
    %c0_41 = arith.constant 0 : index
    %c0_42 = arith.constant 0 : index
    %c1_43 = arith.constant 1 : index
    %c0_44 = arith.constant 0 : index
    %c0_45 = arith.constant 0 : index
    %41 = vector.load %arg5[%c0_41, %c0_42, %c1_43, %c0_44, %c0_45] : memref<1x1x4x16x8xf32, #tpu.memory_space<vmem>>, vector<1x1x1x16x8xf32>
    %42 = vector.shape_cast %41 : vector<1x1x1x16x8xf32> to vector<16x8xf32>
    %cst_46 = arith.constant dense<0.000000e+00> : vector<8x16xf32>
    %43 = tpu.matmul %38, %40, %cst_46 {dimension_numbers = #tpu.dot_dimension_numbers<[1], [1], [0], [0], [0, 0, 1, 0], [], []>} : vector<8x8xf32>, vector<16x8xf32>, vector<8x16xf32> -> vector<8x16xf32>
    %44 = vector.shape_cast %38 : vector<8x8xf32> to vector<8x1x8xf32>
    %45 = vector.broadcast %44 : vector<8x1x8xf32> to vector<8x16x8xf32>
    %46 = arith.mulf %45, %0 : vector<8x16x8xf32>
    %cst_47 = arith.constant dense<0.000000e+00> : vector<8x16xf32>
    %47 = vector.multi_reduction <add>, %46, %cst_47 [2] : vector<8x16x8xf32> to vector<8x16xf32>
    %48 = arith.addf %43, %47 : vector<8x16xf32>
    %cst_48 = arith.constant 0.353553385 : f32
    %49 = vector.broadcast %cst_48 : f32 to vector<8x16xf32>
    %50 = arith.mulf %48, %49 : vector<8x16xf32>
    %51 = vector.broadcast %2 : vector<1x16xf32> to vector<8x16xf32>
    %52 = arith.addf %50, %51 : vector<8x16xf32>
    %cst_49 = arith.constant dense<0xFF800000> : vector<8xf32>
    %53 = vector.multi_reduction <maximumf>, %52, %cst_49 [1] : vector<8x16xf32> to vector<8xf32>
    %54 = vector.shape_cast %53 : vector<8xf32> to vector<8x1xf32>
    %55 = vector.broadcast %54 : vector<8x1xf32> to vector<8x16xf32>
    %56 = arith.subf %52, %55 : vector<8x16xf32>
    %57 = math.exp %56 : vector<8x16xf32>
    %cst_50 = arith.constant dense<0.000000e+00> : vector<8xf32>
    %58 = vector.multi_reduction <add>, %57, %cst_50 [1] : vector<8x16xf32> to vector<8xf32>
    %59 = vector.shape_cast %58 : vector<8xf32> to vector<8x1xf32>
    %60 = vector.broadcast %59 : vector<8x1xf32> to vector<8x16xf32>
    %61 = arith.divf %57, %60 : vector<8x16xf32>
    %cst_51 = arith.constant dense<0.000000e+00> : vector<8x8xf32>
    %62 = tpu.matmul %61, %42, %cst_51 {dimension_numbers = #tpu.dot_dimension_numbers<[1], [0], [0], [1], [0, 0, 1, 1], [], []>} : vector<8x16xf32>, vector<16x8xf32>, vector<8x8xf32> -> vector<8x8xf32>
    %63 = vector.shape_cast %61 : vector<8x16xf32> to vector<8x16x1xf32>
    %64 = vector.broadcast %63 : vector<8x16x1xf32> to vector<8x16x8xf32>
    %65 = arith.mulf %64, %0 : vector<8x16x8xf32>
    %cst_52 = arith.constant dense<0.000000e+00> : vector<8x8xf32>
    %66 = vector.multi_reduction <add>, %65, %cst_52 [1] : vector<8x16x8xf32> to vector<8x8xf32>
    %67 = arith.addf %62, %66 : vector<8x8xf32>
    %c0_53 = arith.constant 0 : index
    %c0_54 = arith.constant 0 : index
    %c1_55 = arith.constant 1 : index
    %c0_56 = arith.constant 0 : index
    %c0_57 = arith.constant 0 : index
    %68 = vector.load %arg9[%c0_53, %c0_54, %c1_55, %c0_56, %c0_57] : memref<1x1x4x8x16xf32, #tpu.memory_space<vmem>>, vector<1x1x1x8x16xf32>
    %69 = vector.shape_cast %68 : vector<1x1x1x8x16xf32> to vector<8x16xf32>
    %70 = vector.shape_cast %61 : vector<8x16xf32> to vector<1x1x1x8x16xf32>
    tpu.vector_store %arg9[%c0_53, %c0_54, %c1_55, %c0_56, %c0_57], %70 {strides = array<i32>} : memref<1x1x4x8x16xf32, #tpu.memory_space<vmem>>, vector<1x1x1x8x16xf32>,
    %c0_58 = arith.constant 0 : index
    %c0_59 = arith.constant 0 : index
    %c2 = arith.constant 2 : index
    %c0_60 = arith.constant 0 : index
    %c0_61 = arith.constant 0 : index
    %71 = vector.load %arg3[%c0_58, %c0_59, %c2, %c0_60, %c0_61] : memref<1x1x4x8x8xf32, #tpu.memory_space<vmem>>, vector<1x1x1x8x8xf32>
    %72 = vector.shape_cast %71 : vector<1x1x1x8x8xf32> to vector<8x8xf32>
    %c0_62 = arith.constant 0 : index
    %c0_63 = arith.constant 0 : index
    %c2_64 = arith.constant 2 : index
    %c0_65 = arith.constant 0 : index
    %c0_66 = arith.constant 0 : index
    %73 = vector.load %arg4[%c0_62, %c0_63, %c2_64, %c0_65, %c0_66] : memref<1x1x4x16x8xf32, #tpu.memory_space<vmem>>, vector<1x1x1x16x8xf32>
    %74 = vector.shape_cast %73 : vector<1x1x1x16x8xf32> to vector<16x8xf32>
    %c0_67 = arith.constant 0 : index
    %c0_68 = arith.constant 0 : index
    %c2_69 = arith.constant 2 : index
    %c0_70 = arith.constant 0 : index
    %c0_71 = arith.constant 0 : index
    %75 = vector.load %arg5[%c0_67, %c0_68, %c2_69, %c0_70, %c0_71] : memref<1x1x4x16x8xf32, #tpu.memory_space<vmem>>, vector<1x1x1x16x8xf32>
    %76 = vector.shape_cast %75 : vector<1x1x1x16x8xf32> to vector<16x8xf32>
    %cst_72 = arith.constant dense<0.000000e+00> : vector<8x16xf32>
    %77 = tpu.matmul %72, %74, %cst_72 {dimension_numbers = #tpu.dot_dimension_numbers<[1], [1], [0], [0], [0, 0, 1, 0], [], []>} : vector<8x8xf32>, vector<16x8xf32>, vector<8x16xf32> -> vector<8x16xf32>
    %78 = vector.shape_cast %72 : vector<8x8xf32> to vector<8x1x8xf32>
    %79 = vector.broadcast %78 : vector<8x1x8xf32> to vector<8x16x8xf32>
    %80 = arith.mulf %79, %0 : vector<8x16x8xf32>
    %cst_73 = arith.constant dense<0.000000e+00> : vector<8x16xf32>
    %81 = vector.multi_reduction <add>, %80, %cst_73 [2] : vector<8x16x8xf32> to vector<8x16xf32>
    %82 = arith.addf %77, %81 : vector<8x16xf32>
    %cst_74 = arith.constant 0.353553385 : f32
    %83 = vector.broadcast %cst_74 : f32 to vector<8x16xf32>
    %84 = arith.mulf %82, %83 : vector<8x16xf32>
    %85 = vector.broadcast %2 : vector<1x16xf32> to vector<8x16xf32>
    %86 = arith.addf %84, %85 : vector<8x16xf32>
    %cst_75 = arith.constant dense<0xFF800000> : vector<8xf32>
    %87 = vector.multi_reduction <maximumf>, %86, %cst_75 [1] : vector<8x16xf32> to vector<8xf32>
    %88 = vector.shape_cast %87 : vector<8xf32> to vector<8x1xf32>
    %89 = vector.broadcast %88 : vector<8x1xf32> to vector<8x16xf32>
    %90 = arith.subf %86, %89 : vector<8x16xf32>
    %91 = math.exp %90 : vector<8x16xf32>
    %cst_76 = arith.constant dense<0.000000e+00> : vector<8xf32>
    %92 = vector.multi_reduction <add>, %91, %cst_76 [1] : vector<8x16xf32> to vector<8xf32>
    %93 = vector.shape_cast %92 : vector<8xf32> to vector<8x1xf32>
    %94 = vector.broadcast %93 : vector<8x1xf32> to vector<8x16xf32>
    %95 = arith.divf %91, %94 : vector<8x16xf32>
    %cst_77 = arith.constant dense<0.000000e+00> : vector<8x8xf32>
    %96 = tpu.matmul %95, %76, %cst_77 {dimension_numbers = #tpu.dot_dimension_numbers<[1], [0], [0], [1], [0, 0, 1, 1], [], []>} : vector<8x16xf32>, vector<16x8xf32>, vector<8x8xf32> -> vector<8x8xf32>
    %97 = vector.shape_cast %95 : vector<8x16xf32> to vector<8x16x1xf32>
    %98 = vector.broadcast %97 : vector<8x16x1xf32> to vector<8x16x8xf32>
    %99 = arith.mulf %98, %0 : vector<8x16x8xf32>
    %cst_78 = arith.constant dense<0.000000e+00> : vector<8x8xf32>
    %100 = vector.multi_reduction <add>, %99, %cst_78 [1] : vector<8x16x8xf32> to vector<8x8xf32>
    %101 = arith.addf %96, %100 : vector<8x8xf32>
    %c0_79 = arith.constant 0 : index
    %c0_80 = arith.constant 0 : index
    %c2_81 = arith.constant 2 : index
    %c0_82 = arith.constant 0 : index
    %c0_83 = arith.constant 0 : index
    %102 = vector.load %arg9[%c0_79, %c0_80, %c2_81, %c0_82, %c0_83] : memref<1x1x4x8x16xf32, #tpu.memory_space<vmem>>, vector<1x1x1x8x16xf32>
    %103 = vector.shape_cast %102 : vector<1x1x1x8x16xf32> to vector<8x16xf32>
    %104 = vector.shape_cast %95 : vector<8x16xf32> to vector<1x1x1x8x16xf32>
    tpu.vector_store %arg9[%c0_79, %c0_80, %c2_81, %c0_82, %c0_83], %104 {strides = array<i32>} : memref<1x1x4x8x16xf32, #tpu.memory_space<vmem>>, vector<1x1x1x8x16xf32>,
    %c0_84 = arith.constant 0 : index
    %c0_85 = arith.constant 0 : index
    %c3 = arith.constant 3 : index
    %c0_86 = arith.constant 0 : index
    %c0_87 = arith.constant 0 : index
    %105 = vector.load %arg3[%c0_84, %c0_85, %c3, %c0_86, %c0_87] : memref<1x1x4x8x8xf32, #tpu.memory_space<vmem>>, vector<1x1x1x8x8xf32>
    %106 = vector.shape_cast %105 : vector<1x1x1x8x8xf32> to vector<8x8xf32>
    %c0_88 = arith.constant 0 : index
    %c0_89 = arith.constant 0 : index
    %c3_90 = arith.constant 3 : index
    %c0_91 = arith.constant 0 : index
    %c0_92 = arith.constant 0 : index
    %107 = vector.load %arg4[%c0_88, %c0_89, %c3_90, %c0_91, %c0_92] : memref<1x1x4x16x8xf32, #tpu.memory_space<vmem>>, vector<1x1x1x16x8xf32>
    %108 = vector.shape_cast %107 : vector<1x1x1x16x8xf32> to vector<16x8xf32>
    %c0_93 = arith.constant 0 : index
    %c0_94 = arith.constant 0 : index
    %c3_95 = arith.constant 3 : index
    %c0_96 = arith.constant 0 : index
    %c0_97 = arith.constant 0 : index
    %109 = vector.load %arg5[%c0_93, %c0_94, %c3_95, %c0_96, %c0_97] : memref<1x1x4x16x8xf32, #tpu.memory_space<vmem>>, vector<1x1x1x16x8xf32>
    %110 = vector.shape_cast %109 : vector<1x1x1x16x8xf32> to vector<16x8xf32>
    %cst_98 = arith.constant dense<0.000000e+00> : vector<8x16xf32>
    %111 = tpu.matmul %106, %108, %cst_98 {dimension_numbers = #tpu.dot_dimension_numbers<[1], [1], [0], [0], [0, 0, 1, 0], [], []>} : vector<8x8xf32>, vector<16x8xf32>, vector<8x16xf32> -> vector<8x16xf32>
    %112 = vector.shape_cast %106 : vector<8x8xf32> to vector<8x1x8xf32>
    %113 = vector.broadcast %112 : vector<8x1x8xf32> to vector<8x16x8xf32>
    %114 = arith.mulf %113, %0 : vector<8x16x8xf32>
    %cst_99 = arith.constant dense<0.000000e+00> : vector<8x16xf32>
    %115 = vector.multi_reduction <add>, %114, %cst_99 [2] : vector<8x16x8xf32> to vector<8x16xf32>
    %116 = arith.addf %111, %115 : vector<8x16xf32>
    %cst_100 = arith.constant 0.353553385 : f32
    %117 = vector.broadcast %cst_100 : f32 to vector<8x16xf32>
    %118 = arith.mulf %116, %117 : vector<8x16xf32>
    %119 = vector.broadcast %2 : vector<1x16xf32> to vector<8x16xf32>
    %120 = arith.addf %118, %119 : vector<8x16xf32>
    %cst_101 = arith.constant dense<0xFF800000> : vector<8xf32>
    %121 = vector.multi_reduction <maximumf>, %120, %cst_101 [1] : vector<8x16xf32> to vector<8xf32>
    %122 = vector.shape_cast %121 : vector<8xf32> to vector<8x1xf32>
    %123 = vector.broadcast %122 : vector<8x1xf32> to vector<8x16xf32>
    %124 = arith.subf %120, %123 : vector<8x16xf32>
    %125 = math.exp %124 : vector<8x16xf32>
    %cst_102 = arith.constant dense<0.000000e+00> : vector<8xf32>
    %126 = vector.multi_reduction <add>, %125, %cst_102 [1] : vector<8x16xf32> to vector<8xf32>
    %127 = vector.shape_cast %126 : vector<8xf32> to vector<8x1xf32>
    %128 = vector.broadcast %127 : vector<8x1xf32> to vector<8x16xf32>
    %129 = arith.divf %125, %128 : vector<8x16xf32>
    %cst_103 = arith.constant dense<0.000000e+00> : vector<8x8xf32>
    %130 = tpu.matmul %129, %110, %cst_103 {dimension_numbers = #tpu.dot_dimension_numbers<[1], [0], [0], [1], [0, 0, 1, 1], [], []>} : vector<8x16xf32>, vector<16x8xf32>, vector<8x8xf32> -> vector<8x8xf32>
    %131 = vector.shape_cast %129 : vector<8x16xf32> to vector<8x16x1xf32>
    %132 = vector.broadcast %131 : vector<8x16x1xf32> to vector<8x16x8xf32>
    %133 = arith.mulf %132, %0 : vector<8x16x8xf32>
    %cst_104 = arith.constant dense<0.000000e+00> : vector<8x8xf32>
    %134 = vector.multi_reduction <add>, %133, %cst_104 [1] : vector<8x16x8xf32> to vector<8x8xf32>
    %135 = arith.addf %130, %134 : vector<8x8xf32>
    %c0_105 = arith.constant 0 : index
    %c0_106 = arith.constant 0 : index
    %c3_107 = arith.constant 3 : index
    %c0_108 = arith.constant 0 : index
    %c0_109 = arith.constant 0 : index
    %136 = vector.load %arg9[%c0_105, %c0_106, %c3_107, %c0_108, %c0_109] : memref<1x1x4x8x16xf32, #tpu.memory_space<vmem>>, vector<1x1x1x8x16xf32>
    %137 = vector.shape_cast %136 : vector<1x1x1x8x16xf32> to vector<8x16xf32>
    %138 = vector.shape_cast %129 : vector<8x16xf32> to vector<1x1x1x8x16xf32>
    tpu.vector_store %arg9[%c0_105, %c0_106, %c3_107, %c0_108, %c0_109], %138 {strides = array<i32>} : memref<1x1x4x8x16xf32, #tpu.memory_space<vmem>>, vector<1x1x1x8x16xf32>,
    %139 = tpu.concatenate %33, %67, %101, %135 in 1 : vector<8x8xf32>, vector<8x8xf32>, vector<8x8xf32>, vector<8x8xf32> -> vector<8x32xf32>
    %c0_110 = arith.constant 0 : index
    %c0_111 = arith.constant 0 : index
    %c0_112 = arith.constant 0 : index
    %140 = vector.load %arg8[%c0_110, %c0_111, %c0_112] : memref<1x8x32xf32, #tpu.memory_space<vmem>>, vector<1x8x32xf32>
    %141 = vector.shape_cast %140 : vector<1x8x32xf32> to vector<8x32xf32>
    %142 = vector.shape_cast %139 : vector<8x32xf32> to vector<1x8x32xf32>
    tpu.vector_store %arg8[%c0_110, %c0_111, %c0_112], %142 {strides = array<i32>} : memref<1x8x32xf32, #tpu.memory_space<vmem>>, vector<1x8x32xf32>,
    return
  }
  func.func @transform_0(%arg0: i32, %arg1: i32, %arg2: i32) -> (i32, i32, i32, i32, i32) {
    %c0_i32 = arith.constant 0 : i32
    %c0_i32_0 = arith.constant 0 : i32
    %c0_i32_1 = arith.constant 0 : i32
    return %arg1, %arg2, %c0_i32, %arg0, %c0_i32_0 : i32, i32, i32, i32, i32
  }
  func.func @transform_1(%arg0: i32, %arg1: i32, %arg2: i32) -> (i32, i32, i32, i32, i32) {
    %c0_i32 = arith.constant 0 : i32
    %c0_i32_0 = arith.constant 0 : i32
    %c0_i32_1 = arith.constant 0 : i32
    %c0_i32_2 = arith.constant 0 : i32
    return %arg1, %arg2, %c0_i32, %c0_i32_0, %c0_i32_1 : i32, i32, i32, i32, i32
  }
  func.func @transform_2(%arg0: i32, %arg1: i32, %arg2: i32) -> (i32, i32, i32, i32, i32) {
    %c0_i32 = arith.constant 0 : i32
    %c0_i32_0 = arith.constant 0 : i32
    %c0_i32_1 = arith.constant 0 : i32
    %c0_i32_2 = arith.constant 0 : i32
    return %arg1, %arg2, %c0_i32, %c0_i32_0, %c0_i32_1 : i32, i32, i32, i32, i32
  }
  func.func @transform_3(%arg0: i32, %arg1: i32, %arg2: i32) -> (i32, i32, i32) {
    %c0_i32 = arith.constant 0 : i32
    %c0_i32_0 = arith.constant 0 : i32
    %c0_i32_1 = arith.constant 0 : i32
    return %arg0, %c0_i32, %c0_i32_0 : i32, i32, i32
  }
  func.func @transform_4(%arg0: i32, %arg1: i32, %arg2: i32) -> (i32, i32, i32, i32) {
    %c0_i32 = arith.constant 0 : i32
    %c0_i32_0 = arith.constant 0 : i32
    %c0_i32_1 = arith.constant 0 : i32
    %c0_i32_2 = arith.constant 0 : i32
    return %arg1, %c0_i32, %c0_i32_0, %c0_i32_1 : i32, i32, i32, i32
  }
  func.func @transform_5(%arg0: i32, %arg1: i32, %arg2: i32) -> (i32, i32, i32) {
    %c0_i32 = arith.constant 0 : i32
    return %arg1, %arg0, %arg2 : i32, i32, i32
  }
  func.func @transform_6(%arg0: i32, %arg1: i32, %arg2: i32) -> (i32, i32, i32, i32, i32) {
    %c0_i32 = arith.constant 0 : i32
    %c0_i32_0 = arith.constant 0 : i32
    %c0_i32_1 = arith.constant 0 : i32
    return %arg1, %arg2, %c0_i32, %arg0, %c0_i32_0 : i32, i32, i32, i32, i32
  }
}

</mosaic_0001>

<bundles_post_ra>
// kernel: tpu_custom_call.1
= control target key start
LH: loop header
LB: loop body
LE: loop exit
PB: predicated region body
PF: predicated region fallthrough
CT: control target
= control target key end

     0   :  { %s4702_s0 = inlined_call_operand.vmem [shape: f32[2,1,4,16,8], index: 0, kind: input, shape index: {}]   ;;  %s4703_s1 = inlined_call_operand.vmem [shape: f32[2,1,4,16,8], index: 1, kind: input, shape index: {}]   ;;  %s4704_s2 = inlined_call_operand.vmem [shape: f32[2,1,4,16,8], index: 2, kind: input, shape index: {}]   ;;  %s4705_s3 = inlined_call_operand.vmem [shape: f32[16,16,8], index: 3, kind: input, shape index: {}]   ;;  %s4706_s4 = inlined_call_operand.vmem [shape: f32[2,1,1,16], index: 4, kind: input, shape index: {}]   ;;  %s4707_s5 = inlined_call_operand.hbm [shape: f32[2,16,32], index: 5, kind: output, shape index: {0}]   ;;  %s4708_s6 = inlined_call_operand.hbm [shape: f32[2,1,4,16,16], index: 6, kind: output, shape index: {1}]  }
   0x1   :  { %4710 = sst [smem:[#allocation9_spill]] %s4702_s0 }
   0x2   :  { %12 = vsyncpa [#allocation4], 0 }
   0x3   :  { %14 = vsyncpa [#allocation4 + $0x1], 0 }
   0x4   :  { %15 = vsyncpa [#allocation6], 0 }
   0x5   :  { %17 = vsyncpa [#allocation6 + $0x1], 0  ;;  %s3623_s21 = smov 0   ;;  %s3625_s22 = smov 0  }
   0x6   :  { %s3627_s23 = smov 0   ;;  %s3629_s24 = smov 0  }
   0x7   :  { %s3631_s25 = smov 0   ;;  %s3633_s26 = smov 0  }
   0x8   :  { %s3635_s27 = smov 0   ;;  %s3637_s28 = smov 0  }
   0x9 LB: > { %s3190_s29 = sadd.s32 4294967295, %s3576_s28   ;;  %s3191_s30 = sadd.s32 4294967294, %s3576_s28   ;;  %s3576_s28 = sphi %s3637_s28, %s23_s28   ;;  %s3572_s27 = sphi %s3635_s27, %s4723_s27   ;;  %s3568_s26 = sphi %s3633_s26, %s4722_s26   ;;  %s3564_s25 = sphi %s3631_s25, %s4721_s25   ;;  %s3560_s24 = sphi %s3629_s24, %s4720_s24   ;;  %s3556_s23 = sphi %s3627_s23, %s4719_s23   ;;  %s3552_s22 = sphi %s3625_s22, %s4718_s22   ;;  %s3548_s21 = sphi %s3623_s21, %s4717_s21  }
   0xa   : > { %s38_s7 = sadd.s32 1, %s3568_s26  ;;  %s42_s8 = sadd.s32 1, %s3572_s27 }
   0xb   : > { %p40_p0 = scmp.ge.s32.totalorder %s38_s7, 2  ;;  %p60_p1 = scmp.ne.s32.totalorder %s3556_s23, %s3552_s22 }
   0xc   : > { %p61_p2 = scmp.eq.s32.totalorder %s3576_s28, 0  ;;  %p202_p5 = scmp.eq.s32.totalorder %s3190_s29, 3 }
   0xd   : > { %s4725_s7 = smov (%p40_p0, %s38_s7), 0  ;;  %s4727_s8 = smov (!%p40_p0, %s42_s8), %s3572_s27 }
   0xe   : > { %s46_s9 = ssub.s32 %s3568_s26, %s4725_s7  ;;  %p3675_p3 = por %p61_p2, %p60_p1 }
   0xf   : > { %p44_p4 = scmp.ge.s32.totalorder %s4727_s8, 2  ;;  %p207_p6 = scmp.ne.s32.totalorder %s3552_s22, %s3548_s21 }
  0x10   : > { %p208_p7 = scmp.eq.s32.totalorder %s3191_s30, 3  ;;  %p3683_p8 = por %p202_p5, %p60_p1 }
  0x11   : > { %s4729_s8 = smov (%p44_p4, %s4727_s8), 0  ;;  %s53_s15 = sadd.s32 1, %s3556_s23 }
  0x12   : > { %p3687_p9 = por %p208_p7, %p207_p6  ;;  %s49_s13 = ssub.s32 %s3572_s27, %s4729_s8 }
  0x13   : > { %s50_s14 = sor.u32 %s49_s13, %s46_s9  ;;  %p3193_p11 = scmp.ge.s32.totalorder %s3576_s28, 4 }
  0x14   : > { %p51_p10 = scmp.eq.s32.totalorder %s50_s14, 0 }
  0x15   : > { %254 = sbr.rel (%p3193_p11) target bundleno = 38 (0x26), region = 16 }
  0x16   : > { %s3695_s16 = scalar_select %p51_p10, %s3556_s23, %s53_s15  }
  0x1a   : > { %257 = sbr.rel (!%p3675_p3) target bundleno = 38 (0x26), region = 20  ;;  %s259_s17 = sand.u32 (%p3675_p3), 1, %s3556_s23  }
  0x1b   : > { %s3195_s18 = sshll.u32 (%p3675_p3), %s3568_s26, 3  ;;  %s3194_s19 = sshll.u32 (%p3675_p3), %s259_s17, 5 }
  0x1c   : > { %s265_s20 = sadd.s32 (%p3675_p3), %s3572_s27, %s3195_s18  ;;  %s4714_s0 = sld [smem:[#allocation9_spill]] (%p3675_p3) }
  0x1d   : > { %s3196_s29 = sshll.u32 (%p3675_p3), %s265_s20, 3  ;;  %s261_s14 = scalar_lea.vmem (%p3675_p3), [#allocation2], %s3194_s19 }
  0x22   : > { %s267_s13 = scalar_lea.vmem %s4714_s0, %s3196_s29 }
  0x23   : > { %v302_v0 = vld [vmem:[%s267_s13] sm:$0xff]  ;;  %v304_v1 = vld [vmem:[%s267_s13 + $0x10] sm:$0xff] }
  0x24   : > { %v306_v2 = vld [vmem:[%s267_s13 + $0x20] sm:$0xff]  ;;  %303 = vst [vmem:[%s261_s14] sm:$0xff] %v302_v0  ;;  %305 = vst [vmem:[%s261_s14 + $0x8] sm:$0xff] %v304_v1  ;;  %v308_v3 = vld [vmem:[%s267_s13 + $0x30] sm:$0xff] }
  0x25   : > { %307 = vst [vmem:[%s261_s14 + $0x10] sm:$0xff] %v306_v2  ;;  %309 = vst [vmem:[%s261_s14 + $0x18] sm:$0xff] %v308_v3 }
  0x26 PF: > { %p3197_p12 = scmp.ge.s32.totalorder %s3576_s28, 1  ;;  %p354_p13 = scmp.lt.s32.totalorder %s3576_s28, 5 }
  0x28   : > { %p355_p0 = pnand %p3197_p12, %p354_p13 }
  0x29   : > { %p422_p1 = scmp.lt.s32.totalorder (!%p355_p0), %s3560_s24, 1  ;;  %s3710_s10 = sand.u32 (!%p355_p0), 1, %s3552_s22  }
  0x2a   : > { %358 = sbr.rel (%p355_p0) target bundleno = 2451 (0x993), region = 74  ;;  %s3198_s15 = sshll.u32 (!%p355_p0), %s3710_s10, 5 }
  0x2b   : > { %s3728_s19 = scalar_lea.vmem (!%p355_p0), [#allocation2], %s3198_s15  ;;  %s3205_s9 = sshll.u32 (!%p355_p0), %s3564_s25, 3 }
  0x2c   : > { %p441_p2 = scmp.lt.s32.totalorder (!%p355_p0), %s3205_s9, 15 }
  0x2f   : > { %v477_v4 = vlaneseq  ;;  %v3578_v5 = vmov 0.0   ;;  %vm3579_vm0 = vmmov 0   ;;  %s3717_s17 = scalar_select %p422_p1, %s3560_s24, 1  ;;  %v3580_v6 = vmov 1966171168   ;;  %v467_v9 = vld [vmem:[%s3728_s19] sm:$0xff] }
  0x30   : > { %3278 = vmatprep.subr.mxu0 %v3578_v5  ;;  %3282 = vmatprep.mubr.msk.f32.mxu0 %vm3579_vm0, %v3578_v5  ;;  %v475_v7 = vunpack.c.l.s4 %v3580_v6  ;;  %vm578_vm1 = vcmask 64512   ;;  %v473_v11 = vcombine.high %v467_v9, %v467_v9  ;;  %s4731_s9 = smov (!%p441_p2, %s3205_s9), 15  ;;  %vm654_vm2 = vcmask 130112  }
  0x31   : > { %v3720_v8 = vshrl.u32 %v477_v4, 7  ;;  %3285 = vmatprep.subr.mxu1 %v3578_v5  ;;  %3289 = vmatprep.mubr.msk.f32.mxu1 %vm3579_vm0, %v3578_v5  ;;  %s3251_s18 = sshll.u32 %s3717_s17, 6  ;;  %s3253_s13 = sshll.u32 %s4731_s9, 4  ;;  %vm719_vm3 = vcmask 1041409   ;;  %vm721_vm4 = vcmask 1042434   ;;  %vm723_vm5 = vcmask 1043459  }
  0x32   : > { %v476_v10 = vunpack.c.0.s8 %v475_v7  ;;  %s3736_s30 = scalar_lea.vmem %s4703_s1, %s3251_s18  ;;  %s3757_s29 = scalar_lea.vmem %s4705_s3, %s3253_s13  ;;  %vm725_vm6 = vcmask 1044484   ;;  %vm727_vm7 = vcmask 1045509   ;;  %vm729_vm8 = vcmask 1046534  }
  0x33   : > { %v469_v12 = vld [vmem:[%s3736_s30 + $0x8] sm:$0xff]  ;;  %v468_v14 = vld [vmem:[%s3736_s30] sm:$0xff]  ;;  %v3748_v16 = vsub.s32 0, %v3720_v8  ;;  %v3777_v32 = vld [vmem:[%s3757_s29 + $0x10] sm:$0xff]  ;;  %vm731_vm9 = vcmask 1047559   ;;  %s449_s14 = scalar_lea.vmem %s4706_s4, %s3717_s17  ;;  %vm820_vm10 = vcmask 130048   ;;  %s3908_s13 = scalar_lea.vmem %s4704_s2, %s3251_s18 }
  0x34   : > { %v3740_v13 = vsub.s32 %v476_v10, %v3720_v8  ;;  %3279 = vmatpush3.xpose.msk.msra.mxu0 %vm578_vm1, %v469_v12  ;;  %v3764_v24 = vld [vmem:[%s3757_s29] sm:$0xff]  ;;  %v3767_v25 = vld [vmem:[%s3757_s29 + $0x48] sm:$0xff]  ;;  %v3784_v35 = vld [vmem:[%s3757_s29 + $0x18] sm:$0xff]  ;;  %s3972_s17 = scalar_lea.vmem [#allocation5], %s3198_s15  ;;  %s4709_s15 = smov 8  }
  0x35   : > { %3280 = vmatprep.subr.mxu0 %v3578_v5  ;;  %v3770_v26 = vld [vmem:[%s3757_s29 + $0x8] sm:$0xff]  ;;  %v3781_v34 = vld [vmem:[%s3757_s29 + $0x40] sm:$0xff]  ;;  %v3809_v53 = vld [vmem:[%s3757_s29 + $0x58] sm:$0xff]  ;;  %s3582_s18 = smov 16  }
  0x36   : > { %v480_v15 = vrot.slane %v467_v9, %v3740_v13  ;;  %v487_v17 = vrot.slane %v473_v11, %v3740_v13  ;;  %v3798_v45 = vld [vmem:[%s3757_s29 + $0x28] sm:$0xff]  ;;  %v3801_v46 = vld [vmem:[%s3757_s29 + $0x20] sm:$0xff]  ;;  %v3812_v54 = vld [vmem:[%s3757_s29 + $0x50] sm:$0xff] }
  0x37   : > { %v3820_v61 = vld [vmem:[%s3757_s29 + $0x38] sm:$0xff]  ;;  %v3823_v62 = vld [vmem:[%s3757_s29 + $0x30] sm:$0xff]  ;;  %v3831_v6 = vld [vmem:[%s3757_s29 + $0x68] sm:$0xff] }
  0x38   : > { %v488_v18 = vcombine.high %v480_v15, %v480_v15  ;;  %v496_v19 = vrot.slane %v480_v15, %v3740_v13  ;;  %v503_v20 = vrot.slane %v487_v17, %v3740_v13  ;;  %3281 = vmatpush3.xpose.msk.msra.mxu0 %vm578_vm1, %v468_v14  ;;  %v489_v28 = vcombine.high %v487_v17, %v487_v17  ;;  %v3842_v17 = vld [vmem:[%s3757_s29 + $0x78] sm:$0xff] }
  0x39   : > { %3299 = vmatprep.subr.mxu0 %v3578_v5 }
  0x3a   : > { %v525_v21 = vrot.slane %v496_v19, %v3748_v16  ;;  %v541_v22 = vrot.slane %v503_v20, %v3748_v16  ;;  %v510_v23 = vrot.slane %v488_v18, %v3740_v13  ;;  %v518_v27 = vcombine.high %v496_v19, %v496_v19  ;;  %v3845_v18 = vld [vmem:[%s3757_s29 + $0x70] sm:$0xff] }
  0x3b   : > { %3283 = vmatmul.mubr.msk.f32.vlgmr.msra.gmra.mxu0 %vm578_vm1, %v467_v9  ;;  %v517_v40 = vrot.slane %v489_v28, %v3740_v13  ;;  %v519_v56 = vcombine.high %v503_v20, %v503_v20  ;;  %v3834_v9 = vld [vmem:[%s3757_s29 + $0x60] sm:$0xff] }
  0x3c   : > { %v562_v29 = vmul.f32 %v525_v21, %v3764_v24  ;;  %v571_v30 = vmul.f32 %v541_v22, %v3767_v25  ;;  %v563_v31 = vmul.f32 %v525_v21, %v3770_v26  ;;  %v529_v33 = vrot.slane %v510_v23, %v3748_v16  ;;  %3303 = vmatprep.mubr.msk.f32.mxu0 %vm3579_vm0, %v3578_v5 }
  0x3d   : > { %v570_v39 = vmul.f32 %v541_v22, %v3781_v34  ;;  %v533_v44 = vrot.slane %v518_v27, %v3748_v16  ;;  %v545_v47 = vrot.slane %v517_v40, %v3748_v16  ;;  %v520_v48 = vcombine.high %v510_v23, %v510_v23 }
  0x3e   : > { %v579_v36 = vsel %vm578_vm1, %v562_v29, 0.0  ;;  %v606_v37 = vsel %vm578_vm1, %v571_v30, 0.0  ;;  %v564_v38 = vmul.f32 %v529_v33, %v3777_v32  ;;  %v582_v41 = vsel %vm578_vm1, %v563_v31, 0.0 }
  0x3f   : > { %580 = vadd.xlane.f32.xlu0 %v579_v36  ;;  %607 = vadd.xlane.f32.xlu1 %v606_v37  ;;  %v565_v43 = vmul.f32 %v529_v33, %v3784_v35  ;;  %v603_v50 = vsel %vm578_vm1, %v570_v39, 0.0  ;;  %v567_v51 = vmul.f32 %v533_v44, %v3798_v45  ;;  %v566_v52 = vmul.f32 %v533_v44, %v3801_v46 }
  0x40   : > { %v585_v42 = vsel %vm578_vm1, %v564_v38, 0.0  ;;  %v573_v55 = vmul.f32 %v545_v47, %v3809_v53  ;;  %v572_v59 = vmul.f32 %v545_v47, %v3812_v54  ;;  %v537_v60 = vrot.slane %v520_v48, %v3748_v16 }
  0x41   : > { %v588_v49 = vsel %vm578_vm1, %v565_v43, 0.0  ;;  %v594_v57 = vsel %vm578_vm1, %v567_v51, 0.0  ;;  %v591_v58 = vsel %vm578_vm1, %v566_v52, 0.0  ;;  %v549_v0 = vrot.slane %v519_v56, %v3748_v16 }
  0x42   : > { %v612_v63 = vsel %vm578_vm1, %v573_v55, 0.0  ;;  %v609_v1 = vsel %vm578_vm1, %v572_v59, 0.0  ;;  %v569_v2 = vmul.f32 %v537_v60, %v3820_v61  ;;  %v568_v3 = vmul.f32 %v537_v60, %v3823_v62 }
  0x43   : > { %583 = vadd.xlane.f32.xlu0 %v582_v41  ;;  %586 = vadd.xlane.f32.xlu1 %v585_v42  ;;  %v521_v7 = vcombine.high %v517_v40, %v517_v40  ;;  %v575_v10 = vmul.f32 %v549_v0, %v3831_v6  ;;  %v574_v14 = vmul.f32 %v549_v0, %v3834_v9  ;;  %v644_v37 = vand.u32 127, %v477_v4 }
  0x44   : > { %v600_v11 = vsel %vm578_vm1, %v569_v2, 0.0  ;;  %v597_v12 = vsel %vm578_vm1, %v568_v3, 0.0 }
  0x45   : > { %v553_v15 = vrot.slane %v521_v7, %v3748_v16  ;;  %v618_v19 = vsel %vm578_vm1, %v575_v10, 0.0  ;;  %v615_v20 = vsel %vm578_vm1, %v574_v14, 0.0  ;;  %v649_v40 = vadd.s32 4294967288, %v644_v37 }
  0x46   : > { %v3855_v43 = vsub.s32 %v644_v37, %v3720_v8 }
  0x47   : > { %589 = vadd.xlane.f32.xlu1 %v588_v49  ;;  %604 = vadd.xlane.f32.xlu0 %v603_v50  ;;  %v577_v21 = vmul.f32 %v553_v15, %v3842_v17  ;;  %v576_v22 = vmul.f32 %v553_v15, %v3845_v18  ;;  %v3858_v44 = vsub.s32 %v649_v40, %v3720_v8 }
  0x49   : > { %v624_v23 = vsel %vm578_vm1, %v577_v21, 0.0  ;;  %v621_v27 = vsel %vm578_vm1, %v576_v22, 0.0 }
  0x4b   : > { %595 = vadd.xlane.f32.xlu1 %v594_v57  ;;  %592 = vadd.xlane.f32.xlu0 %v591_v58 }
  0x4f   : > { %613 = vadd.xlane.f32.xlu1 %v612_v63  ;;  %610 = vadd.xlane.f32.xlu0 %v609_v1 }
  0x53   : > { %601 = vadd.xlane.f32.xlu1 %v600_v11  ;;  %598 = vadd.xlane.f32.xlu0 %v597_v12 }
  0x57   : > { %619 = vadd.xlane.f32.xlu1 %v618_v19  ;;  %616 = vadd.xlane.f32.xlu0 %v615_v20 }
  0x5b   : > { %625 = vadd.xlane.f32.xlu1 %v624_v23  ;;  %622 = vadd.xlane.f32.xlu0 %v621_v27 }
  0xc8   : > { %v581_v28 = vpop.xlane.xlu0 %580  ;;  %v608_v29 = vpop.xlane.xlu1 %607 }
  0xc9   : > { %v648_v47 = vrot.slane %v581_v28, %v3855_v43  ;;  %v690_v2 = vrot.slane %v608_v29, %v3858_v44 }
  0xcc   : > { %v584_v30 = vpop.xlane.xlu0 %583  ;;  %v587_v31 = vpop.xlane.xlu1 %586 }
  0xcd   : > { %v653_v48 = vrot.slane %v584_v30, %v3858_v44  ;;  %v659_v49 = vrot.slane %v587_v31, %v3855_v43 }
  0xcf   : > { %v655_v56 = vsel %vm654_vm2, %v653_v48, %v648_v47 }
  0xd0   : > { %v590_v33 = vpop.xlane.xlu1 %589  ;;  %v605_v36 = vpop.xlane.xlu0 %604 }
  0xd1   : > { %v663_v50 = vrot.slane %v590_v33, %v3858_v44  ;;  %v686_v3 = vrot.slane %v605_v36, %v3855_v43 }
  0xd3   : > { %v664_v57 = vsel %vm654_vm2, %v663_v50, %v659_v49  ;;  %v691_v14 = vsel %vm654_vm2, %v690_v2, %v686_v3 }
  0xd4   : > { %v596_v38 = vpop.xlane.xlu1 %595  ;;  %v593_v39 = vpop.xlane.xlu0 %592  ;;  %v720_v60 = vsel %vm719_vm3, %v664_v57, %v655_v56  ;;  %v470_v56 = vld [vmem:[%s3908_s13] sm:$0xff]  ;;  %v3914_v57 = vld [vmem:[%s3728_s19 + $0x8] sm:$0xff] }
  0xd5   : > { %v672_v52 = vrot.slane %v596_v38, %v3858_v44  ;;  %v668_v55 = vrot.slane %v593_v39, %v3855_v43 }
  0xd7   : > { %v673_v63 = vsel %vm654_vm2, %v672_v52, %v668_v55  ;;  %v471_v55 = vld [vmem:[%s3908_s13 + $0x8] sm:$0xff] }
  0xd8   : > { %v614_v41 = vpop.xlane.xlu1 %613  ;;  %v611_v42 = vpop.xlane.xlu0 %610  ;;  %v722_v7 = vsel %vm721_vm4, %v673_v63, %v720_v60  ;;  %3286 = vmatpush3.msra.mxu1 %v471_v55 }
  0xd9   : > { %v699_v11 = vrot.slane %v614_v41, %v3858_v44  ;;  %v695_v12 = vrot.slane %v611_v42, %v3855_v43  ;;  %v3895_v41 = vld [vmem:[%s449_s14] ss:$0 sm:$0xff]  ;;  %3287 = vmatprep.subr.mxu1 %v3578_v5 }
  0xda   : > { %3288 = vmatpush3.msra.mxu1 %v470_v56 }
  0xdb   : > { %v700_v23 = vsel %vm654_vm2, %v699_v11, %v695_v12  ;;  %3292 = vmatprep.subr.mxu1 %v3578_v5 }
  0xdc   : > { %v602_v4 = vpop.xlane.xlu1 %601  ;;  %v599_v51 = vpop.xlane.xlu0 %598 }
  0xdd   : > { %v681_v58 = vrot.slane %v602_v4, %v3858_v44  ;;  %v677_v59 = vrot.slane %v599_v51, %v3855_v43 }
  0xdf   : > { %v682_v10 = vsel %vm654_vm2, %v681_v58, %v677_v59  ;;  %v1114_v58 = vrot.slane %v3914_v57, %v3740_v13 }
  0xe0   : > { %v620_v0 = vpop.xlane.xlu1 %619  ;;  %v617_v1 = vpop.xlane.xlu0 %616  ;;  %v724_v15 = vsel %vm723_vm5, %v682_v10, %v722_v7 }
  0xe1   : > { %v708_v21 = vrot.slane %v620_v0, %v3858_v44  ;;  %v704_v22 = vrot.slane %v617_v1, %v3855_v43  ;;  %v726_v29 = vsel %vm725_vm6, %v691_v14, %v724_v15  ;;  %v1130_v59 = vrot.slane %v1114_v58, %v3740_v13 }
  0xe2   : > { %v728_v31 = vsel %vm727_vm7, %v700_v23, %v726_v29  ;;  %v1122_v63 = vcombine.high %v1114_v58, %v1114_v58  ;;  %v1107_v0 = vcombine.high %v3914_v57, %v3914_v57 }
  0xe3   : > { %v709_v30 = vsel %vm654_vm2, %v708_v21, %v704_v22  ;;  %v1159_v60 = vrot.slane %v1130_v59, %v3748_v16  ;;  %v1152_v12 = vcombine.high %v1130_v59, %v1130_v59 }
  0xe4   : > { %v626_v19 = vpop.xlane.xlu1 %625  ;;  %v623_v20 = vpop.xlane.xlu0 %622  ;;  %v730_v36 = vsel %vm729_vm8, %v709_v30, %v728_v31  ;;  %v1144_v3 = vrot.slane %v1122_v63, %v3740_v13  ;;  %v1121_v15 = vrot.slane %v1107_v0, %v3740_v13 }
  0xe5   : > { %v717_v27 = vrot.slane %v626_v19, %v3858_v44  ;;  %v713_v28 = vrot.slane %v623_v20, %v3855_v43  ;;  %v1196_v1 = vmul.f32 %v1159_v60, %v3764_v24  ;;  %v1197_v2 = vmul.f32 %v1159_v60, %v3770_v26 }
  0xe6   : > { %v1163_v11 = vrot.slane %v1144_v3, %v3748_v16  ;;  %v1154_v14 = vcombine.high %v1144_v3, %v1144_v3  ;;  %v1167_v21 = vrot.slane %v1152_v12, %v3748_v16  ;;  %v1137_v23 = vrot.slane %v1121_v15, %v3740_v13 }
  0xe7   : > { %v718_v33 = vsel %vm654_vm2, %v717_v27, %v713_v28  ;;  %v1212_v7 = vsel %vm578_vm1, %v1196_v1, 0.0  ;;  %v1215_v10 = vsel %vm578_vm1, %v1197_v2, 0.0  ;;  %v1123_v27 = vcombine.high %v1121_v15, %v1121_v15 }
  0xe8   : > { %v732_v37 = vsel %vm731_vm9, %v718_v33, %v730_v36  ;;  %v1198_v19 = vmul.f32 %v1163_v11, %v3777_v32  ;;  %v1199_v20 = vmul.f32 %v1163_v11, %v3784_v35  ;;  %v1171_v22 = vrot.slane %v1154_v14, %v3748_v16 }
  0xe9   : > { %v1200_v30 = vmul.f32 %v1167_v21, %v3801_v46  ;;  %v1201_v31 = vmul.f32 %v1167_v21, %v3798_v45 }
  0xea   : > { %v1218_v28 = vsel %vm578_vm1, %v1198_v19, 0.0  ;;  %v1221_v29 = vsel %vm578_vm1, %v1199_v20, 0.0  ;;  %v1202_v33 = vmul.f32 %v1171_v22, %v3823_v62  ;;  %v1203_v36 = vmul.f32 %v1171_v22, %v3820_v61  ;;  %v3215_v22 = vld [vmem:[%s3736_s30 + $0x18] sm:$0xff] }
  0xfb   : > { %v808_v38 = vpop.f32.mrf.mxu0 }
  0xfc   : > { %v809_v39 = vadd.f32 %v808_v38, %v732_v37  ;;  %v1224_v37 = vsel %vm578_vm1, %v1200_v30, 0.0  ;;  %v1227_v38 = vsel %vm578_vm1, %v1201_v31, 0.0 }
  0xfd   : > { %v3284_v40 = vpop.f32.mrf.mxu0 }
  0xfe   : > { %v812_v42 = vmul.f32 0.35355338, %v809_v39  ;;  %v1175_v39 = vrot.slane %v1137_v23, %v3748_v16  ;;  %v1151_v40 = vrot.slane %v1123_v27, %v3740_v13 }
 0x100   : > { %v819_v47 = vadd.f32 %v3895_v41, %v812_v42  ;;  %v1230_v42 = vsel %vm578_vm1, %v1202_v33, 0.0  ;;  %v1155_v55 = vcombine.high %v1151_v40, %v1151_v40 }
 0x102   : > { %v821_v48 = vsel %vm820_vm10, %v819_v47, -inf  ;;  %v1187_v3 = vrot.slane %v1155_v55, %v3748_v16 }
 0x103   : > { %822 = vmax.xlane.f32.xlu0 %v821_v48  ;;  %v1233_v48 = vsel %vm578_vm1, %v1203_v36, 0.0 }
 0x104   : > { %v1210_v11 = vmul.f32 %v1187_v3, %v3845_v18  ;;  %v1211_v12 = vmul.f32 %v1187_v3, %v3842_v17 }
 0x106   : > { %v1254_v14 = vsel %vm578_vm1, %v1210_v11, 0.0  ;;  %v1257_v15 = vsel %vm578_vm1, %v1211_v12, 0.0 }
 0x107   : > { %1213 = vadd.xlane.f32.xlu0 %v1212_v7 }
 0x10b   : > { %1219 = vadd.xlane.f32.xlu0 %v1218_v28 }
 0x10f   : > { %1225 = vadd.xlane.f32.xlu0 %v1224_v37 }
 0x113   : > { %1231 = vadd.xlane.f32.xlu0 %v1230_v42 }
 0x18c   : > { %v823_v49 = vpop.xlane.xlu0 %822 }
 0x18d   : > { %v824_v50 = vsub.f32 %v819_v47, %v823_v49  ;;  %v1153_v47 = vcombine.high %v1137_v23, %v1137_v23  ;;  %v1204_v49 = vmul.f32 %v1175_v39, %v3781_v34 }
 0x18f   : > { %v825_v4 = vmul.f32 1.442695, %v824_v50  ;;  %v1205_v50 = vmul.f32 %v1175_v39, %v3767_v25  ;;  %v1236_v56 = vsel %vm578_vm1, %v1204_v49, 0.0 }
 0x190   : > { %1237 = vadd.xlane.f32.xlu0 %v1236_v56  ;;  %v1214_v27 = vpop.xlane.xlu0 %1213 }
 0x191   : > { %3422 = vpow2.f32 %v825_v4  ;;  %v1179_v4 = vrot.slane %v1151_v40, %v3748_v16  ;;  %v1239_v58 = vsel %vm578_vm1, %v1205_v50, 0.0  ;;  %v1279_v40 = vrot.slane %v1214_v27, %v3855_v43 }
 0x193   : > { %v1206_v59 = vmul.f32 %v1179_v4, %v3812_v54  ;;  %v1207_v60 = vmul.f32 %v1179_v4, %v3809_v53 }
 0x195   : > { %v1242_v0 = vsel %vm578_vm1, %v1206_v59, 0.0  ;;  %v1245_v1 = vsel %vm578_vm1, %v1207_v60, 0.0 }
 0x196   : > { %1243 = vadd.xlane.f32.xlu0 %v1242_v0 }
 0x19e   : > { %v3899_v51 = vpop.eup %3422 }
 0x19f   : > { %v827_v52 = vsel %vm820_vm10, %v3899_v51, 0.0 }
 0x1a0   : > { %828 = vadd.xlane.f32.xlu1 %v827_v52  ;;  %v1183_v52 = vrot.slane %v1153_v47, %v3748_v16 }
 0x1a2   : > { %v1208_v63 = vmul.f32 %v1183_v52, %v3834_v9  ;;  %v1209_v2 = vmul.f32 %v1183_v52, %v3831_v6 }
 0x1a4   : > { %1216 = vadd.xlane.f32.xlu1 %v1215_v10  ;;  %v1248_v7 = vsel %vm578_vm1, %v1208_v63, 0.0  ;;  %v1251_v10 = vsel %vm578_vm1, %v1209_v2, 0.0 }
 0x1a5   : > { %1249 = vadd.xlane.f32.xlu0 %v1248_v7 }
 0x1a8   : > { %1222 = vadd.xlane.f32.xlu1 %v1221_v29  ;;  %v1220_v29 = vpop.xlane.xlu0 %1219 }
 0x1a9   : > { %1255 = vadd.xlane.f32.xlu0 %v1254_v14 }
 0x1ac   : > { %1228 = vadd.xlane.f32.xlu1 %v1227_v38  ;;  %v1226_v31 = vpop.xlane.xlu0 %1225 }
 0x1b0   : > { %1234 = vadd.xlane.f32.xlu1 %v1233_v48  ;;  %v1232_v36 = vpop.xlane.xlu0 %1231  ;;  %v1297_v48 = vrot.slane %v1226_v31, %v3855_v43 }
 0x1b1   : > { %v1306_v56 = vrot.slane %v1232_v36, %v3855_v43 }
 0x1b4   : > { %1240 = vadd.xlane.f32.xlu1 %v1239_v58 }
 0x1b8   : > { %1246 = vadd.xlane.f32.xlu1 %v1245_v1 }
 0x1bc   : > { %1252 = vadd.xlane.f32.xlu1 %v1251_v10 }
 0x1c0   : > { %1258 = vadd.xlane.f32.xlu1 %v1257_v15 }
 0x219   : > { %v1238_v38 = vpop.xlane.xlu0 %1237 }
 0x21a   : > { %v1315_v63 = vrot.slane %v1238_v38, %v3855_v43 }
 0x21f   : > { %v1244_v50 = vpop.xlane.xlu0 %1243 }
 0x220   : > { %v1324_v10 = vrot.slane %v1244_v50, %v3855_v43 }
 0x229   : > { %v829_v19 = vpop.xlane.xlu1 %828 }
 0x22a   : > { %3424 = vrcp.f32 %v829_v19 }
 0x22d   : > { %v1217_v23 = vpop.xlane.xlu1 %1216 }
 0x22e   : > { %v1283_v39 = vrot.slane %v1217_v23, %v3858_v44  ;;  %v1250_v1 = vpop.xlane.xlu0 %1249 }
 0x22f   : > { %v1333_v15 = vrot.slane %v1250_v1, %v3855_v43 }
 0x230   : > { %v1284_v4 = vsel %vm654_vm2, %v1283_v39, %v1279_v40 }
 0x231   : > { %v1223_v28 = vpop.xlane.xlu1 %1222 }
 0x232   : > { %v1292_v42 = vrot.slane %v1223_v28, %v3858_v44 }
 0x235   : > { %v1229_v30 = vpop.xlane.xlu1 %1228 }
 0x236   : > { %v1301_v47 = vrot.slane %v1229_v30, %v3858_v44 }
 0x237   : > { %v3425_v20 = vpop.eup %3424 }
 0x238   : > { %v3967_v21 = vmul.f32 %v3425_v20, %v3899_v51  ;;  %v3214_v51 = vld [vmem:[%s3736_s30 + $0x10] sm:$0xff]  ;;  %v1302_v59 = vsel %vm654_vm2, %v1301_v47, %v1297_v48  ;;  %v1256_v20 = vpop.xlane.xlu0 %1255 }
 0x239   : > { %v1235_v33 = vpop.xlane.xlu1 %1234  ;;  %v1342_v28 = vrot.slane %v1256_v20, %v3855_v43 }
 0x23a   : > { %1097 = vst.msk [vmem:[%s3972_s17] sm:$0xff] %vm820_vm10, %v3967_v21  ;;  %3290 = vmatmul.mubr.msk.f32.vlgmr.msra.gmra.mxu1 %vm820_vm10, %v3967_v21  ;;  %v1310_v55 = vrot.slane %v1235_v33, %v3858_v44 }
 0x23b   : > { %3293 = vmatpush3.xpose.msk.msra.mxu1 %vm578_vm1, %v3215_v22  ;;  %3296 = vmatprep.mubr.msk.f32.mxu1 %vm3579_vm0, %v3578_v5 }
 0x23c   : > { %3294 = vmatprep.subr.mxu1 %v3578_v5  ;;  %v1311_v3 = vsel %vm654_vm2, %v1310_v55, %v1306_v56  ;;  %v3217_v55 = vld [vmem:[%s3908_s13 + $0x18] sm:$0xff]  ;;  %v3216_v56 = vld [vmem:[%s3908_s13 + $0x10] sm:$0xff] }
 0x23d   : > { %v1241_v37 = vpop.xlane.xlu1 %1240  ;;  %3300 = vmatpush3.msra.mxu0 %v3217_v55 }
 0x23e   : > { %v1319_v60 = vrot.slane %v1241_v37, %v3858_v44  ;;  %3301 = vmatprep.subr.mxu0 %v3578_v5 }
 0x23f   : > { %3295 = vmatpush3.xpose.msk.msra.mxu1 %vm578_vm1, %v3214_v51  ;;  %3302 = vmatpush3.msra.mxu0 %v3216_v56 }
 0x240   : > { %3313 = vmatprep.subr.mxu1 %v3578_v5  ;;  %v1320_v12 = vsel %vm654_vm2, %v1319_v60, %v1315_v63  ;;  %3306 = vmatprep.subr.mxu0 %v3578_v5 }
 0x241   : > { %v1247_v49 = vpop.xlane.xlu1 %1246 }
 0x242   : > { %3297 = vmatmul.mubr.msk.f32.vlgmr.msra.gmra.mxu1 %vm578_vm1, %v3914_v57  ;;  %v1288_v57 = vrot.slane %v1220_v29, %v3855_v43  ;;  %v1328_v7 = vrot.slane %v1247_v49, %v3858_v44 }
 0x243   : > { %3317 = vmatprep.mubr.msk.f32.mxu1 %vm3579_vm0, %v3578_v5 }
 0x244   : > { %v1293_v52 = vsel %vm654_vm2, %v1292_v42, %v1288_v57  ;;  %v1329_v22 = vsel %vm654_vm2, %v1328_v7, %v1324_v10 }
 0x245   : > { %v1348_v58 = vsel %vm719_vm3, %v1293_v52, %v1284_v4  ;;  %v1253_v0 = vpop.xlane.xlu1 %1252 }
 0x246   : > { %v1349_v2 = vsel %vm721_vm4, %v1302_v59, %v1348_v58  ;;  %v1337_v14 = vrot.slane %v1253_v0, %v3858_v44  ;;  %v4034_v58 = vld [vmem:[%s3728_s19 + $0x10] sm:$0xff] }
 0x247   : > { %v1350_v11 = vsel %vm723_vm5, %v1311_v3, %v1349_v2  ;;  %v1730_v59 = vrot.slane %v4034_v58, %v3740_v13  ;;  %v1723_v1 = vcombine.high %v4034_v58, %v4034_v58 }
 0x248   : > { %v1351_v51 = vsel %vm725_vm6, %v1320_v12, %v1350_v11  ;;  %v1338_v30 = vsel %vm654_vm2, %v1337_v14, %v1333_v15 }
 0x249   : > { %v1259_v19 = vpop.xlane.xlu1 %1258  ;;  %v1352_v31 = vsel %vm727_vm7, %v1329_v22, %v1351_v51  ;;  %v1746_v60 = vrot.slane %v1730_v59, %v3740_v13  ;;  %v1738_v0 = vcombine.high %v1730_v59, %v1730_v59 }
 0x24a   : > { %v1346_v27 = vrot.slane %v1259_v19, %v3858_v44  ;;  %v1353_v36 = vsel %vm729_vm8, %v1338_v30, %v1352_v31  ;;  %v1737_v19 = vrot.slane %v1723_v1, %v3740_v13 }
 0x24b   : > { %v1775_v63 = vrot.slane %v1746_v60, %v3748_v16  ;;  %v1760_v7 = vrot.slane %v1738_v0, %v3740_v13  ;;  %v1768_v14 = vcombine.high %v1746_v60, %v1746_v60 }
 0x24c   : > { %v1347_v33 = vsel %vm654_vm2, %v1346_v27, %v1342_v28  ;;  %v1753_v28 = vrot.slane %v1737_v19, %v3740_v13 }
 0x24d   : > { %v1354_v37 = vsel %vm731_vm9, %v1347_v33, %v1353_v36  ;;  %v1812_v2 = vmul.f32 %v1775_v63, %v3764_v24  ;;  %v1813_v3 = vmul.f32 %v1775_v63, %v3770_v26  ;;  %v1779_v12 = vrot.slane %v1760_v7, %v3748_v16 }
 0x24e   : > { %v1770_v15 = vcombine.high %v1760_v7, %v1760_v7  ;;  %v1783_v51 = vrot.slane %v1768_v14, %v3748_v16 }
 0x24f   : > { %v1828_v10 = vsel %vm578_vm1, %v1812_v2, 0.0  ;;  %v1831_v11 = vsel %vm578_vm1, %v1813_v3, 0.0  ;;  %v1814_v20 = vmul.f32 %v1779_v12, %v3777_v32  ;;  %v1815_v22 = vmul.f32 %v1779_v12, %v3784_v35 }
 0x250   : > { %v1787_v27 = vrot.slane %v1770_v15, %v3748_v16  ;;  %v1816_v33 = vmul.f32 %v1783_v51, %v3801_v46  ;;  %v1817_v36 = vmul.f32 %v1783_v51, %v3798_v45 }
 0x251   : > { %v1834_v30 = vsel %vm578_vm1, %v1814_v20, 0.0  ;;  %v1837_v31 = vsel %vm578_vm1, %v1815_v22, 0.0 }
 0x2fa   : > { %v4014_v23 = vpop.f32.mrf.mxu1 }
 0x2fc   : > { %v3291_v29 = vpop.f32.mrf.mxu1 }
 0x2fd   : > { %v1739_v29 = vcombine.high %v1737_v19, %v1737_v19 }
 0x302   : > { %v1430_v38 = vpop.f32.mrf.mxu1 }
 0x303   : > { %v1431_v39 = vadd.f32 %v1430_v38, %v1354_v37  ;;  %v1818_v37 = vmul.f32 %v1787_v27, %v3823_v62  ;;  %v1819_v38 = vmul.f32 %v1787_v27, %v3820_v61 }
 0x304   : > { %v3298_v40 = vpop.f32.mrf.mxu1 }
 0x305   : > { %v1434_v42 = vmul.f32 0.35355338, %v1431_v39  ;;  %v1840_v39 = vsel %vm578_vm1, %v1816_v33, 0.0  ;;  %v1843_v40 = vsel %vm578_vm1, %v1817_v36, 0.0 }
 0x307   : > { %v1435_v57 = vadd.f32 %v3895_v41, %v1434_v42  ;;  %v1791_v42 = vrot.slane %v1753_v28, %v3748_v16 }
 0x309   : > { %v1436_v47 = vsel %vm820_vm10, %v1435_v57, -inf }
 0x30a   : > { %1437 = vmax.xlane.f32.xlu0 %v1436_v47  ;;  %v1846_v47 = vsel %vm578_vm1, %v1818_v37, 0.0 }
 0x30e   : > { %1829 = vadd.xlane.f32.xlu0 %v1828_v10 }
 0x312   : > { %1835 = vadd.xlane.f32.xlu0 %v1834_v30  ;;  %v3224_v30 = vld [vmem:[%s3736_s30 + $0x20] sm:$0xff] }
 0x316   : > { %1841 = vadd.xlane.f32.xlu0 %v1840_v39 }
 0x31a   : > { %1847 = vadd.xlane.f32.xlu0 %v1846_v47 }
 0x393   : > { %v1438_v48 = vpop.xlane.xlu0 %1437 }
 0x394   : > { %v1439_v49 = vsub.f32 %v1435_v57, %v1438_v48  ;;  %v1767_v57 = vrot.slane %v1739_v29, %v3740_v13  ;;  %v1769_v48 = vcombine.high %v1753_v28, %v1753_v28  ;;  %v3225_v29 = vld [vmem:[%s3736_s30 + $0x28] sm:$0xff] }
 0x396   : > { %v1440_v50 = vmul.f32 1.442695, %v1439_v49  ;;  %v1849_v49 = vsel %vm578_vm1, %v1819_v38, 0.0  ;;  %v1795_v55 = vrot.slane %v1767_v57, %v3748_v16  ;;  %v1799_v56 = vrot.slane %v1769_v48, %v3748_v16 }
 0x397   : > { %v1771_v59 = vcombine.high %v1767_v57, %v1767_v57 }
 0x398   : > { %3426 = vpow2.f32 %v1440_v50  ;;  %v1820_v50 = vmul.f32 %v1791_v42, %v3781_v34  ;;  %v1822_v0 = vmul.f32 %v1795_v55, %v3812_v54  ;;  %v1823_v1 = vmul.f32 %v1795_v55, %v3809_v53 }
 0x399   : > { %v1824_v2 = vmul.f32 %v1799_v56, %v3834_v9  ;;  %v1825_v10 = vmul.f32 %v1799_v56, %v3831_v6 }
 0x39a   : > { %v1852_v60 = vsel %vm578_vm1, %v1820_v50, 0.0  ;;  %v1858_v3 = vsel %vm578_vm1, %v1822_v0, 0.0  ;;  %v1861_v7 = vsel %vm578_vm1, %v1823_v1, 0.0 }
 0x39b   : > { %1853 = vadd.xlane.f32.xlu0 %v1852_v60  ;;  %v1864_v12 = vsel %vm578_vm1, %v1824_v2, 0.0  ;;  %v1867_v14 = vsel %vm578_vm1, %v1825_v10, 0.0 }
 0x39f   : > { %1859 = vadd.xlane.f32.xlu0 %v1858_v3 }
 0x3a3   : > { %1865 = vadd.xlane.f32.xlu0 %v1864_v12 }
 0x3a5   : > { %v4025_v4 = vpop.eup %3426 }
 0x3a6   : > { %v1442_v52 = vsel %vm820_vm10, %v4025_v4, 0.0 }
 0x3a7   : > { %1443 = vadd.xlane.f32.xlu1 %v1442_v52  ;;  %v1821_v52 = vmul.f32 %v1791_v42, %v3767_v25 }
 0x3a9   : > { %v1855_v63 = vsel %vm578_vm1, %v1821_v52, 0.0 }
 0x3ab   : > { %1832 = vadd.xlane.f32.xlu1 %v1831_v11  ;;  %v1803_v11 = vrot.slane %v1771_v59, %v3748_v16 }
 0x3ad   : > { %v1826_v15 = vmul.f32 %v1803_v11, %v3845_v18  ;;  %v1827_v19 = vmul.f32 %v1803_v11, %v3842_v17 }
 0x3af   : > { %1838 = vadd.xlane.f32.xlu1 %v1837_v31  ;;  %v1870_v20 = vsel %vm578_vm1, %v1826_v15, 0.0  ;;  %v1873_v22 = vsel %vm578_vm1, %v1827_v19, 0.0  ;;  %v1830_v31 = vpop.xlane.xlu0 %1829 }
 0x3b0   : > { %1871 = vadd.xlane.f32.xlu0 %v1870_v20  ;;  %v1895_v48 = vrot.slane %v1830_v31, %v3855_v43 }
 0x3b3   : > { %1844 = vadd.xlane.f32.xlu1 %v1843_v40  ;;  %v1836_v36 = vpop.xlane.xlu0 %1835 }
 0x3b7   : > { %1850 = vadd.xlane.f32.xlu1 %v1849_v49  ;;  %v1842_v38 = vpop.xlane.xlu0 %1841 }
 0x3b8   : > { %v1913_v52 = vrot.slane %v1842_v38, %v3855_v43 }
 0x3bb   : > { %1856 = vadd.xlane.f32.xlu1 %v1855_v63  ;;  %v1848_v40 = vpop.xlane.xlu0 %1847 }
 0x3bc   : > { %v1922_v0 = vrot.slane %v1848_v40, %v3855_v43 }
 0x3bf   : > { %1862 = vadd.xlane.f32.xlu1 %v1861_v7 }
 0x3c3   : > { %1868 = vadd.xlane.f32.xlu1 %v1867_v14 }
 0x3c7   : > { %1874 = vadd.xlane.f32.xlu1 %v1873_v22 }
 0x424   : > { %v1854_v57 = vpop.xlane.xlu0 %1853 }
 0x425   : > { %v1931_v7 = vrot.slane %v1854_v57, %v3855_v43 }
 0x428   : > { %v1860_v56 = vpop.xlane.xlu0 %1859 }
 0x429   : > { %v1940_v19 = vrot.slane %v1860_v56, %v3855_v43 }
 0x42c   : > { %v1866_v11 = vpop.xlane.xlu0 %1865 }
 0x430   : > { %v1444_v51 = vpop.xlane.xlu1 %1443 }
 0x431   : > { %3428 = vrcp.f32 %v1444_v51 }
 0x43e   : > { %v3429_v27 = vpop.eup %3428 }
 0x43f   : > { %v4086_v28 = vmul.f32 %v3429_v27, %v4025_v4  ;;  %v1833_v4 = vpop.xlane.xlu1 %1832  ;;  %v1949_v27 = vrot.slane %v1866_v11, %v3855_v43 }
 0x440   : > { %v1899_v47 = vrot.slane %v1833_v4, %v3858_v44 }
 0x441   : > { %3222 = vst.msk [vmem:[%s3972_s17 + $0x8] sm:$0xff] %vm820_vm10, %v4086_v28  ;;  %3304 = vmatmul.mubr.msk.f32.vlgmr.msra.gmra.mxu0 %vm820_vm10, %v4086_v28 }
 0x442   : > { %3307 = vmatpush3.xpose.msk.msra.mxu0 %vm578_vm1, %v3225_v29  ;;  %3310 = vmatprep.mubr.msk.f32.mxu0 %vm3579_vm0, %v3578_v5  ;;  %v1900_v59 = vsel %vm654_vm2, %v1899_v47, %v1895_v48 }
 0x443   : > { %3308 = vmatprep.subr.mxu0 %v3578_v5  ;;  %v1839_v33 = vpop.xlane.xlu1 %1838 }
 0x444   : > { %v1908_v49 = vrot.slane %v1839_v33, %v3858_v44 }
 0x446   : > { %3309 = vmatpush3.xpose.msk.msra.mxu0 %vm578_vm1, %v3224_v30  ;;  %v1872_v30 = vpop.xlane.xlu0 %1871 }
 0x447   : > { %3327 = vmatprep.subr.mxu0 %v3578_v5  ;;  %v1845_v37 = vpop.xlane.xlu1 %1844 }
 0x448   : > { %v1917_v50 = vrot.slane %v1845_v37, %v3858_v44  ;;  %v1958_v37 = vrot.slane %v1872_v30, %v3855_v43 }
 0x449   : > { %3311 = vmatmul.mubr.msk.f32.vlgmr.msra.gmra.mxu0 %vm578_vm1, %v4034_v58  ;;  %v1904_v58 = vrot.slane %v1836_v36, %v3855_v43 }
 0x44a   : > { %3331 = vmatprep.mubr.msk.f32.mxu0 %vm3579_vm0, %v3578_v5  ;;  %v1918_v2 = vsel %vm654_vm2, %v1917_v50, %v1913_v52 }
 0x44b   : > { %v1851_v39 = vpop.xlane.xlu1 %1850  ;;  %v1909_v60 = vsel %vm654_vm2, %v1908_v49, %v1904_v58 }
 0x44c   : > { %v1926_v63 = vrot.slane %v1851_v39, %v3858_v44  ;;  %v1964_v1 = vsel %vm719_vm3, %v1909_v60, %v1900_v59 }
 0x44d   : > { %v1965_v12 = vsel %vm721_vm4, %v1918_v2, %v1964_v1  ;;  %v3227_v1 = vld [vmem:[%s3908_s13 + $0x28] sm:$0xff]  ;;  %v3226_v2 = vld [vmem:[%s3908_s13 + $0x20] sm:$0xff] }
 0x44e   : > { %v1927_v14 = vsel %vm654_vm2, %v1926_v63, %v1922_v0  ;;  %3314 = vmatpush3.msra.mxu1 %v3227_v1 }
 0x44f   : > { %v1857_v42 = vpop.xlane.xlu1 %1856  ;;  %v1966_v20 = vsel %vm723_vm5, %v1927_v14, %v1965_v12  ;;  %3315 = vmatprep.subr.mxu1 %v3578_v5 }
 0x450   : > { %v1935_v3 = vrot.slane %v1857_v42, %v3858_v44  ;;  %3316 = vmatpush3.msra.mxu1 %v3226_v2 }
 0x451   : > { %3320 = vmatprep.subr.mxu1 %v3578_v5 }
 0x452   : > { %v1936_v22 = vsel %vm654_vm2, %v1935_v3, %v1931_v7  ;;  %v4149_v3 = vld [vmem:[%s3728_s19 + $0x18] sm:$0xff]  ;;  %s3002_s19 = sshll.u32 %s3972_s17, 4  ;;  %s4605_s19 = int_to_ptr.vmem [resolvable:$true] %s3002_s19 }
 0x453   : > { %v1863_v55 = vpop.xlane.xlu1 %1862  ;;  %v1967_v4 = vsel %vm725_vm6, %v1936_v22, %v1966_v20  ;;  %v2346_v7 = vrot.slane %v4149_v3, %v3740_v13  ;;  %v2339_v14 = vcombine.high %v4149_v3, %v4149_v3 }
 0x454   : > { %v1944_v15 = vrot.slane %v1863_v55, %v3858_v44 }
 0x455   : > { %v2354_v12 = vcombine.high %v2346_v7, %v2346_v7 }
 0x456   : > { %v1945_v31 = vsel %vm654_vm2, %v1944_v15, %v1940_v19 }
 0x457   : > { %v1869_v10 = vpop.xlane.xlu1 %1868  ;;  %v1968_v40 = vsel %vm727_vm7, %v1945_v31, %v1967_v4  ;;  %v2376_v20 = vrot.slane %v2354_v12, %v3740_v13  ;;  %v2353_v4 = vrot.slane %v2339_v14, %v3740_v13 }
 0x458   : > { %v1953_v51 = vrot.slane %v1869_v10, %v3858_v44  ;;  %v2362_v10 = vrot.slane %v2346_v7, %v3740_v13 }
 0x459   : > { %v2386_v30 = vcombine.high %v2376_v20, %v2376_v20 }
 0x45a   : > { %v1954_v38 = vsel %vm654_vm2, %v1953_v51, %v1949_v27  ;;  %v2391_v11 = vrot.slane %v2362_v10, %v3748_v16  ;;  %v2395_v27 = vrot.slane %v2376_v20, %v3748_v16 }
 0x45b   : > { %v1875_v29 = vpop.xlane.xlu1 %1874  ;;  %v1969_v57 = vsel %vm729_vm8, %v1954_v38, %v1968_v40  ;;  %v2355_v38 = vcombine.high %v2353_v4, %v2353_v4 }
 0x45c   : > { %v1962_v36 = vrot.slane %v1875_v29, %v3858_v44  ;;  %v2428_v15 = vmul.f32 %v2391_v11, %v3764_v24  ;;  %v2429_v19 = vmul.f32 %v2391_v11, %v3770_v26  ;;  %v2384_v29 = vcombine.high %v2362_v10, %v2362_v10 }
 0x45d   : > { %v2430_v31 = vmul.f32 %v2395_v27, %v3777_v32  ;;  %v2431_v24 = vmul.f32 %v2395_v27, %v3784_v35 }
 0x45e   : > { %v1963_v42 = vsel %vm654_vm2, %v1962_v36, %v1958_v37  ;;  %v2444_v22 = vsel %vm578_vm1, %v2428_v15, 0.0  ;;  %v2447_v51 = vsel %vm578_vm1, %v2429_v19, 0.0  ;;  %v2399_v26 = vrot.slane %v2384_v29, %v3748_v16  ;;  %v3235_v19 = vld [vmem:[%s3736_s30 + $0x38] sm:$0xff] }
 0x45f   : > { %v1970_v47 = vsel %vm731_vm9, %v1963_v42, %v1969_v57  ;;  %v2403_v36 = vrot.slane %v2386_v30, %v3748_v16  ;;  %v2369_v37 = vrot.slane %v2353_v4, %v3740_v13  ;;  %v2453_v40 = vsel %vm578_vm1, %v2431_v24, 0.0 }
 0x460   : > { %v2432_v42 = vmul.f32 %v2399_v26, %v3801_v46  ;;  %v2433_v57 = vmul.f32 %v2399_v26, %v3798_v45 }
 0x461   : > { %v2434_v32 = vmul.f32 %v2403_v36, %v3823_v62  ;;  %v2435_v35 = vmul.f32 %v2403_v36, %v3820_v61 }
 0x463   : > { %v2462_v46 = vsel %vm578_vm1, %v2434_v32, 0.0  ;;  %v2465_v45 = vsel %vm578_vm1, %v2435_v35, 0.0 }
 0x501   : > { %v4129_v33 = vpop.f32.mrf.mxu0 }
 0x503   : > { %v3305_v39 = vpop.f32.mrf.mxu0 }
 0x504   : > { %v2450_v39 = vsel %vm578_vm1, %v2430_v31, 0.0 }
 0x509   : > { %v2046_v48 = vpop.f32.mrf.mxu0 }
 0x50a   : > { %v2047_v49 = vadd.f32 %v2046_v48, %v1970_v47  ;;  %v2456_v47 = vsel %vm578_vm1, %v2432_v42, 0.0  ;;  %v2459_v48 = vsel %vm578_vm1, %v2433_v57, 0.0 }
 0x50b   : > { %v3312_v58 = vpop.f32.mrf.mxu0 }
 0x50c   : > { %v2050_v50 = vmul.f32 0.35355338, %v2047_v49  ;;  %v2407_v49 = vrot.slane %v2369_v37, %v3748_v16  ;;  %v2383_v58 = vrot.slane %v2355_v38, %v3740_v13 }
 0x50e   : > { %v2051_v52 = vadd.f32 %v3895_v41, %v2050_v50  ;;  %v2385_v50 = vcombine.high %v2369_v37, %v2369_v37  ;;  %v2437_v62 = vmul.f32 %v2407_v49, %v3767_v25  ;;  %v2411_v61 = vrot.slane %v2383_v58, %v3748_v16 }
 0x510   : > { %v2052_v55 = vsel %vm820_vm10, %v2051_v52, -inf }
 0x511   : > { %2053 = vmax.xlane.f32.xlu0 %v2052_v55  ;;  %v2415_v55 = vrot.slane %v2385_v50, %v3748_v16 }
 0x513   : > { %v2441_v2 = vmul.f32 %v2415_v55, %v3831_v6 }
 0x515   : > { %2445 = vadd.xlane.f32.xlu0 %v2444_v22 }
 0x519   : > { %2451 = vadd.xlane.f32.xlu0 %v2450_v39 }
 0x51d   : > { %2457 = vadd.xlane.f32.xlu0 %v2456_v47 }
 0x521   : > { %2463 = vadd.xlane.f32.xlu0 %v2462_v46 }
 0x59a   : > { %v2054_v56 = vpop.xlane.xlu0 %2053 }
 0x59b   : > { %v2055_v59 = vsub.f32 %v2051_v52, %v2054_v56  ;;  %v2436_v52 = vmul.f32 %v2407_v49, %v3781_v34  ;;  %v2387_v56 = vcombine.high %v2383_v58, %v2383_v58  ;;  %v2440_v34 = vmul.f32 %v2415_v55, %v3834_v9 }
 0x59d   : > { %v2056_v60 = vmul.f32 1.442695, %v2055_v59  ;;  %v2468_v13 = vsel %vm578_vm1, %v2436_v52, 0.0  ;;  %v2471_v59 = vsel %vm578_vm1, %v2437_v62, 0.0  ;;  %v2419_v7 = vrot.slane %v2387_v56, %v3748_v16 }
 0x59e   : > { %2469 = vadd.xlane.f32.xlu0 %v2468_v13 }
 0x59f   : > { %3430 = vpow2.f32 %v2056_v60  ;;  %v2438_v60 = vmul.f32 %v2411_v61, %v3812_v54  ;;  %v2480_v54 = vsel %vm578_vm1, %v2440_v34, 0.0  ;;  %v2442_v10 = vmul.f32 %v2419_v7, %v3845_v18 }
 0x5a0   : > { %v2443_v9 = vmul.f32 %v2419_v7, %v3842_v17  ;;  %v3234_v17 = vld [vmem:[%s3736_s30 + $0x30] sm:$0xff]  ;;  %s3247_s30 = sshll.u32 %s3560_s24, 3 }
 0x5a1   : > { %v2474_v25 = vsel %vm578_vm1, %v2438_v60, 0.0  ;;  %v2486_v11 = vsel %vm578_vm1, %v2442_v10, 0.0 }
 0x5a2   : > { %2475 = vadd.xlane.f32.xlu0 %v2474_v25  ;;  %v2489_v6 = vsel %vm578_vm1, %v2443_v9, 0.0 }
 0x5a6   : > { %2481 = vadd.xlane.f32.xlu0 %v2480_v54 }
 0x5aa   : > { %2487 = vadd.xlane.f32.xlu0 %v2486_v11 }
 0x5ac   : > { %v4140_v63 = vpop.eup %3430 }
 0x5ad   : > { %v2058_v0 = vsel %vm820_vm10, %v4140_v63, 0.0 }
 0x5ae   : > { %2059 = vadd.xlane.f32.xlu1 %v2058_v0  ;;  %v2439_v0 = vmul.f32 %v2411_v61, %v3809_v53  ;;  %v2483_v53 = vsel %vm578_vm1, %v2441_v2, 0.0 }
 0x5b0   : > { %v2477_v1 = vsel %vm578_vm1, %v2439_v0, 0.0 }
 0x5b2   : > { %2448 = vadd.xlane.f32.xlu1 %v2447_v51 }
 0x5b6   : > { %2454 = vadd.xlane.f32.xlu1 %v2453_v40 }
 0x5ba   : > { %2460 = vadd.xlane.f32.xlu1 %v2459_v48 }
 0x5be   : > { %2466 = vadd.xlane.f32.xlu1 %v2465_v45 }
 0x5c2   : > { %2472 = vadd.xlane.f32.xlu1 %v2471_v59 }
 0x5c6   : > { %2478 = vadd.xlane.f32.xlu1 %v2477_v1 }
 0x5ca   : > { %2484 = vadd.xlane.f32.xlu1 %v2483_v53 }
 0x5ce   : > { %2490 = vadd.xlane.f32.xlu1 %v2489_v6 }
 0x637   : > { %v2060_v12 = vpop.xlane.xlu1 %2059 }
 0x638   : > { %3432 = vrcp.f32 %v2060_v12 }
 0x63b   : > { %v2449_v18 = vpop.xlane.xlu1 %2448 }
 0x63c   : > { %v2515_v24 = vrot.slane %v2449_v18, %v3858_v44 }
 0x63f   : > { %v2455_v20 = vpop.xlane.xlu1 %2454 }
 0x640   : > { %v2524_v36 = vrot.slane %v2455_v20, %v3858_v44 }
 0x643   : > { %v2461_v51 = vpop.xlane.xlu1 %2460 }
 0x645   : > { %v3433_v14 = vpop.eup %3432 }
 0x646   : > { %v4201_v15 = vmul.f32 %v3433_v14, %v4140_v63  ;;  %v2446_v63 = vpop.xlane.xlu0 %2445 }
 0x647   : > { %v2467_v29 = vpop.xlane.xlu1 %2466  ;;  %v2511_v26 = vrot.slane %v2446_v63, %v3855_v43  ;;  %v4255_v63 = vsub.s32 2, %v3720_v8 }
 0x648   : > { %3232 = vst.msk [vmem:[%s3972_s17 + $0x10] sm:$0xff] %vm820_vm10, %v4201_v15  ;;  %3318 = vmatmul.mubr.msk.f32.vlgmr.msra.gmra.mxu1 %vm820_vm10, %v4201_v15  ;;  %v2542_v32 = vrot.slane %v2467_v29, %v3858_v44  ;;  %v4276_v29 = vsub.s32 5, %v3720_v8 }
 0x649   : > { %3321 = vmatpush3.xpose.msk.msra.mxu1 %vm578_vm1, %v3235_v19  ;;  %3324 = vmatprep.mubr.msk.f32.mxu1 %vm3579_vm0, %v3578_v5  ;;  %v2516_v42 = vsel %vm654_vm2, %v2515_v24, %v2511_v26  ;;  %v4259_v20 = vrot.slane %v3967_v21, %v4255_v63  ;;  %v4286_v24 = vsub.s32 7, %v3720_v8 }
 0x64a   : > { %3322 = vmatprep.subr.mxu1 %v3578_v5  ;;  %v2452_v22 = vpop.xlane.xlu0 %2451 }
 0x64b   : > { %v2473_v4 = vpop.xlane.xlu1 %2472  ;;  %v2520_v37 = vrot.slane %v2452_v22, %v3855_v43  ;;  %v4262_v22 = vsub.s32 3, %v3720_v8  ;;  %v912_v26 = vrot.slane %v3967_v21, %v4286_v24 }
 0x64c   : > { %v2551_v49 = vrot.slane %v2473_v4, %v3858_v44  ;;  %v4281_v4 = vsub.s32 6, %v3720_v8 }
 0x64d   : > { %3323 = vmatpush3.xpose.msk.msra.mxu1 %vm578_vm1, %v3234_v17  ;;  %v2525_v57 = vsel %vm654_vm2, %v2524_v36, %v2520_v37  ;;  %v1450_v36 = vrot.slane %v4086_v28, %v3748_v16  ;;  %v4293_v37 = vsub.s32 1, %v3720_v8 }
 0x64e   : > { %v2458_v27 = vpop.xlane.xlu0 %2457  ;;  %v2580_v47 = vsel %vm719_vm3, %v2525_v57, %v2516_v42  ;;  %v1516_v42 = vrot.slane %v4086_v28, %v4281_v4  ;;  %v2066_v57 = vrot.slane %v4201_v15, %v3748_v16 }
 0x64f   : > { %v2529_v38 = vrot.slane %v2458_v27, %v3855_v43  ;;  %v2479_v39 = vpop.xlane.xlu1 %2478 }
 0x650   : > { %3325 = vmatmul.mubr.msk.f32.vlgmr.msra.gmra.mxu1 %vm578_vm1, %v4149_v3  ;;  %v2533_v3 = vrot.slane %v2461_v51, %v3858_v44  ;;  %v2560_v62 = vrot.slane %v2479_v39, %v3858_v44  ;;  %v4270_v51 = vsub.s32 4, %v3720_v8  ;;  %v1483_v39 = vrot.slane %v4086_v28, %v4262_v22 }
 0x651   : > { %v1505_v8 = vrot.slane %v4086_v28, %v4276_v29 }
 0x652   : > { %v2464_v30 = vpop.xlane.xlu0 %2463  ;;  %v2534_v48 = vsel %vm654_vm2, %v2533_v3, %v2529_v38  ;;  %v879_v27 = vrot.slane %v3967_v21, %v4270_v51  ;;  %v1461_v3 = vrot.slane %v4086_v28, %v4293_v37  ;;  %v1472_v38 = vrot.slane %v4086_v28, %v4255_v63 }
 0x653   : > { %v2538_v35 = vrot.slane %v2464_v30, %v3855_v43  ;;  %v2485_v46 = vpop.xlane.xlu1 %2484  ;;  %v2581_v45 = vsel %vm721_vm4, %v2534_v48, %v2580_v47  ;;  %v890_v30 = vrot.slane %v3967_v21, %v4276_v29  ;;  %v2099_v47 = vrot.slane %v4201_v15, %v4262_v22 }
 0x654   : > { %v2569_v13 = vrot.slane %v2485_v46, %v3858_v44  ;;  %v2110_v48 = vrot.slane %v4201_v15, %v4270_v51  ;;  %v2132_v46 = vrot.slane %v4201_v15, %v4281_v4 }
 0x655   : > { %v2543_v52 = vsel %vm654_vm2, %v2542_v32, %v2538_v35  ;;  %v2077_v32 = vrot.slane %v4201_v15, %v4293_v37  ;;  %v2088_v35 = vrot.slane %v4201_v15, %v4255_v63 }
 0x656   : > { %v2470_v31 = vpop.xlane.xlu0 %2469  ;;  %v2582_v55 = vsel %vm723_vm5, %v2543_v52, %v2581_v45 }
 0x657   : > { %v2547_v58 = vrot.slane %v2470_v31, %v3855_v43  ;;  %v2491_v60 = vpop.xlane.xlu1 %2490  ;;  %v901_v31 = vrot.slane %v3967_v21, %v4281_v4 }
 0x658   : > { %v2578_v2 = vrot.slane %v2491_v60, %v3858_v44 }
 0x659   : > { %v2552_v56 = vsel %vm654_vm2, %v2551_v49, %v2547_v58  ;;  %v2121_v49 = vrot.slane %v4201_v15, %v4276_v29  ;;  %v1527_v58 = vrot.slane %v4086_v28, %v4286_v24 }
 0x65a   : > { %v2476_v40 = vpop.xlane.xlu0 %2475  ;;  %v2583_v34 = vsel %vm725_vm6, %v2552_v56, %v2582_v55  ;;  %v846_v55 = vrot.slane %v3967_v21, %v4293_v37  ;;  %v3237_v56 = vld [vmem:[%s3908_s13 + $0x38] sm:$0xff] }
 0x65b   : > { %v2556_v61 = vrot.slane %v2476_v40, %v3855_v43  ;;  %v1494_v40 = vrot.slane %v4086_v28, %v4270_v51  ;;  %3328 = vmatpush3.msra.mxu0 %v3237_v56  ;;  %v4401_v56 = vld [vmem:[%s3757_s29 + $0x38] sm:$0xff] }
 0x65c   : > { %3329 = vmatprep.subr.mxu0 %v3578_v5 }
 0x65d   : > { %v2561_v25 = vsel %vm654_vm2, %v2560_v62, %v2556_v61 }
 0x65e   : > { %v2482_v50 = vpop.xlane.xlu0 %2481  ;;  %v2584_v10 = vsel %vm727_vm7, %v2561_v25, %v2583_v34 }
 0x65f   : > { %v2565_v59 = vrot.slane %v2482_v50, %v3855_v43  ;;  %v2143_v50 = vrot.slane %v4201_v15, %v4286_v24  ;;  %v3236_v15 = vld [vmem:[%s3908_s13 + $0x30] sm:$0xff] }
 0x660   : > { %3330 = vmatpush3.msra.mxu0 %v3236_v15 }
 0x661   : > { %v2570_v54 = vsel %vm654_vm2, %v2569_v13, %v2565_v59 }
 0x662   : > { %v2488_v0 = vpop.xlane.xlu0 %2487  ;;  %v2585_v11 = vsel %vm729_vm8, %v2570_v54, %v2584_v10  ;;  %v4349_v54 = vld [vmem:[%s3757_s29] sm:$0xff] }
 0x663   : > { %v2574_v7 = vrot.slane %v2488_v0, %v3855_v43  ;;  %v835_v43 = vrot.slane %v3967_v21, %v3748_v16 }
 0x665   : > { %v2579_v9 = vsel %vm654_vm2, %v2578_v2, %v2574_v7 }
 0x666   : > { %v2586_v6 = vsel %vm731_vm9, %v2579_v9, %v2585_v11  ;;  %v4355_v11 = vld [vmem:[%s3757_s29 + $0x8] sm:$0xff] }
 0x708   : > { %v4241_v1 = vpop.f32.mrf.mxu1 }
 0x70a   : > { %v3319_v53 = vpop.f32.mrf.mxu1 }
 0x710   : > { %v2662_v12 = vpop.f32.mrf.mxu1 }
 0x711   : > { %v2663_v14 = vadd.f32 %v2662_v12, %v2586_v6 }
 0x712   : > { %v3326_v19 = vpop.f32.mrf.mxu1 }
 0x713   : > { %v2666_v17 = vmul.f32 0.35355338, %v2663_v14 }
 0x715   : > { %v2667_v18 = vadd.f32 %v3895_v41, %v2666_v17  ;;  %v4267_v41 = vrot.slane %v3967_v21, %v4262_v22 }
 0x717   : > { %v2668_v44 = vsel %vm820_vm10, %v2667_v18, -inf }
 0x718   : > { %2669 = vmax.xlane.f32.xlu0 %v2668_v44 }
 0x72e   : > { %837 = vbcast.lane.b32.xlu0 %v835_v43, 256 }
 0x732   : > { %859 = vbcast.lane.b32.xlu0 %v4259_v20, 256 }
 0x736   : > { %870 = vbcast.lane.b32.xlu0 %v4267_v41, 256 }
 0x73a   : > { %881 = vbcast.lane.b32.xlu0 %v879_v27, 256 }
 0x73e   : > { %892 = vbcast.lane.b32.xlu0 %v890_v30, 256 }
 0x742   : > { %903 = vbcast.lane.b32.xlu0 %v901_v31, 256 }
 0x746   : > { %914 = vbcast.lane.b32.xlu0 %v912_v26, 256 }
 0x74a   : > { %1452 = vbcast.lane.b32.xlu0 %v1450_v36, 256 }
 0x74e   : > { %1463 = vbcast.lane.b32.xlu0 %v1461_v3, 256 }
 0x752   : > { %1474 = vbcast.lane.b32.xlu0 %v1472_v38, 256 }
 0x756   : > { %1485 = vbcast.lane.b32.xlu0 %v1483_v39, 256 }
 0x75a   : > { %1496 = vbcast.lane.b32.xlu0 %v1494_v40, 256 }
 0x75e   : > { %1507 = vbcast.lane.b32.xlu0 %v1505_v8, 256 }
 0x762   : > { %1518 = vbcast.lane.b32.xlu0 %v1516_v42, 256 }
 0x766   : > { %2072 = vbcast.lane.b32.xlu0 %v2066_v57, 264 }
 0x76a   : > { %2083 = vbcast.lane.b32.xlu0 %v2077_v32, 264 }
 0x76e   : > { %2094 = vbcast.lane.b32.xlu0 %v2088_v35, 264 }
 0x772   : > { %2105 = vbcast.lane.b32.xlu0 %v2099_v47, 264 }
 0x776   : > { %2116 = vbcast.lane.b32.xlu0 %v2110_v48, 264 }
 0x77a   : > { %2123 = vbcast.lane.b32.xlu0 %v2121_v49, 256 }
 0x77e   : > { %1529 = vbcast.lane.b32.xlu0 %v1527_v58, 256 }
 0x782   : > { %2134 = vbcast.lane.b32.xlu0 %v2132_v46, 256 }
 0x786   : > { %2145 = vbcast.lane.b32.xlu0 %v2143_v50, 256 }
 0x7a1   : > { %v2670_v45 = vpop.xlane.xlu0 %2669 }
 0x7a2   : > { %v2671_v52 = vsub.f32 %v2667_v18, %v2670_v45 }
 0x7a4   : > { %v2672_v62 = vmul.f32 1.442695, %v2671_v52 }
 0x7a5   : > { %v838_v5 = vpop.permute.xlu0 %837 }
 0x7a6   : > { %3434 = vpow2.f32 %v2672_v62  ;;  %v920_v53 = vmul.f32 %v4349_v54, %v838_v5 }
 0x7a8   : > { %v936_v12 = vsel %vm578_vm1, %v920_v53, 0.0 }
 0x7a9   : > { %v860_v21 = vpop.permute.xlu0 %859 }
 0x7ad   : > { %v871_v13 = vpop.permute.xlu0 %870 }
 0x7b1   : > { %v4336_v59 = vpop.permute.xlu0 %881 }
 0x7b3   : > { %v4325_v61 = vpop.eup %3434 }
 0x7b4   : > { %v2674_v28 = vsel %vm820_vm10, %v4325_v61, 0.0 }
 0x7b5   : > { %2675 = vadd.xlane.f32.xlu1 %v2674_v28  ;;  %v4338_v60 = vpop.permute.xlu0 %892 }
 0x7b9   : > { %v4340_v0 = vpop.permute.xlu0 %903 }
 0x7bd   : > { %v4342_v34 = vpop.permute.xlu0 %914 }
 0x7c1   : > { %v4344_v25 = vpop.permute.xlu0 %1452 }
 0x7c5   : > { %v4346_v2 = vpop.permute.xlu0 %1463 }
 0x7c6   : > { %841 = vbcast.lane.b32.xlu1 %v835_v43, 264  ;;  %v4363_v43 = vld [vmem:[%s3757_s29 + $0x10] sm:$0xff] }
 0x7c9   : > { %v4352_v10 = vpop.permute.xlu0 %1474 }
 0x7ca   : > { %848 = vbcast.lane.b32.xlu1 %v846_v55, 256 }
 0x7cd   : > { %v4360_v18 = vpop.permute.xlu0 %1485 }
 0x7ce   : > { %852 = vbcast.lane.b32.xlu1 %v846_v55, 264 }
 0x7d2   : > { %863 = vbcast.lane.b32.xlu1 %v4259_v20, 264 }
 0x7d6   : > { %874 = vbcast.lane.b32.xlu1 %v4267_v41, 264 }
 0x7da   : > { %885 = vbcast.lane.b32.xlu1 %v879_v27, 264 }
 0x7de   : > { %896 = vbcast.lane.b32.xlu1 %v890_v30, 264  ;;  %v4367_v30 = vld [vmem:[%s3757_s29 + $0x18] sm:$0xff] }
 0x7e2   : > { %907 = vbcast.lane.b32.xlu1 %v901_v31, 264 }
 0x7e6   : > { %918 = vbcast.lane.b32.xlu1 %v912_v26, 264 }
 0x7ea   : > { %1456 = vbcast.lane.b32.xlu1 %v1450_v36, 264  ;;  %v4371_v36 = vld [vmem:[%s3757_s29 + $0x20] sm:$0xff] }
 0x7ee   : > { %1467 = vbcast.lane.b32.xlu1 %v1461_v3, 264  ;;  %v924_v3 = vmul.f32 %v4371_v36, %v860_v21 }
 0x7f2   : > { %1478 = vbcast.lane.b32.xlu1 %v1472_v38, 264  ;;  %v4374_v38 = vpop.permute.xlu0 %1496 }
 0x7f6   : > { %1489 = vbcast.lane.b32.xlu1 %v1483_v39, 264  ;;  %v4398_v55 = vpop.permute.xlu0 %1507 }
 0x7fa   : > { %1500 = vbcast.lane.b32.xlu1 %v1494_v40, 264 }
 0x7fe   : > { %1511 = vbcast.lane.b32.xlu1 %v1505_v8, 264 }
 0x802   : > { %2068 = vbcast.lane.b32.xlu1 %v2066_v57, 256 }
 0x806   : > { %2079 = vbcast.lane.b32.xlu1 %v2077_v32, 256 }
 0x80a   : > { %2090 = vbcast.lane.b32.xlu1 %v2088_v35, 256  ;;  %v4385_v35 = vld [vmem:[%s3757_s29 + $0x28] sm:$0xff] }
 0x80e   : > { %2101 = vbcast.lane.b32.xlu1 %v2099_v47, 256 }
 0x812   : > { %2112 = vbcast.lane.b32.xlu1 %v2110_v48, 256 }
 0x816   : > { %1522 = vbcast.lane.b32.xlu1 %v1516_v42, 264 }
 0x81a   : > { %2127 = vbcast.lane.b32.xlu1 %v2121_v49, 264 }
 0x81e   : > { %1533 = vbcast.lane.b32.xlu1 %v1527_v58, 264  ;;  %v954_v58 = vsel %vm578_vm1, %v924_v3, 0.0 }
 0x822   : > { %2138 = vbcast.lane.b32.xlu1 %v2132_v46, 264  ;;  %v4394_v46 = vld [vmem:[%s3757_s29 + $0x30] sm:$0xff] }
 0x826   : > { %2149 = vbcast.lane.b32.xlu1 %v2143_v50, 264  ;;  %v926_v50 = vmul.f32 %v4394_v46, %v871_v13 }
 0x828   : > { %v963_v13 = vsel %vm578_vm1, %v926_v50, 0.0 }
 0x83e   : > { %v2676_v7 = vpop.xlane.xlu1 %2675 }
 0x83f   : > { %3436 = vrcp.f32 %v2676_v7  ;;  %v4408_v7 = vld [vmem:[%s3757_s29 + $0x40] sm:$0xff] }
 0x840   : > { %v928_v53 = vmul.f32 %v4408_v7, %v4336_v59 }
 0x842   : > { %v842_v9 = vpop.permute.xlu1 %841 }
 0x843   : > { %v921_v6 = vmul.f32 %v4355_v11, %v842_v9 }
 0x845   : > { %v937_v14 = vsel %vm578_vm1, %v921_v6, 0.0 }
 0x846   : > { %v938_v19 = vadd.f32 %v937_v14, %v936_v12  ;;  %v849_v17 = vpop.permute.xlu1 %848 }
 0x847   : > { %v922_v20 = vmul.f32 %v4363_v43, %v849_v17 }
 0x848   : > { %v939_v44 = vrot.slane %v938_v19, 4 }
 0x849   : > { %v945_v8 = vsel %vm578_vm1, %v922_v20, 0.0 }
 0x84a   : > { %v940_v41 = vadd.f32 %v939_v44, %v938_v19  ;;  %v853_v27 = vpop.permute.xlu1 %852 }
 0x84b   : > { %v923_v31 = vmul.f32 %v4367_v30, %v853_v27 }
 0x84c   : > { %v3437_v26 = vpop.eup %3436  ;;  %v941_v40 = vrot.slane %v940_v41, 2 }
 0x84d   : > { %v4377_v39 = vmul.f32 %v3437_v26, %v4325_v61  ;;  %v946_v42 = vsel %vm578_vm1, %v923_v31, 0.0  ;;  %v972_v31 = vsel %vm578_vm1, %v928_v53, 0.0  ;;  %v4421_v26 = vld [vmem:[%s3757_s29 + $0x50] sm:$0xff] }
 0x84e   : > { %v947_v57 = vadd.f32 %v946_v42, %v945_v8  ;;  %v864_v32 = vpop.permute.xlu1 %863  ;;  %v942_v45 = vadd.f32 %v941_v40, %v940_v41  ;;  %v930_v3 = vmul.f32 %v4421_v26, %v4338_v60  ;;  %v4425_v40 = vpop.permute.xlu0 %1518 }
 0x84f   : > { %3242 = vst.msk [vmem:[%s3972_s17 + $0x18] sm:$0xff] %vm820_vm10, %v4377_v39  ;;  %v925_v47 = vmul.f32 %v4385_v35, %v864_v32  ;;  %3332 = vmatmul.mubr.msk.f32.vlgmr.msra.gmra.mxu0 %vm820_vm10, %v4377_v39  ;;  %v2682_v48 = vrot.slane %v4377_v39, %v3748_v16  ;;  %v2693_v15 = vrot.slane %v4377_v39, %v4293_v37  ;;  %v4414_v37 = vld [vmem:[%s3757_s29 + $0x48] sm:$0xff] }
 0x850   : > { %v948_v49 = vrot.slane %v947_v57, 4  ;;  %v943_v9 = vrot.slane %v942_v45, 1  ;;  %v2704_v20 = vrot.slane %v4377_v39, %v4255_v63  ;;  %v2715_v60 = vrot.slane %v4377_v39, %v4262_v22 }
 0x851   : > { %v955_v52 = vsel %vm578_vm1, %v925_v47, 0.0  ;;  %2688 = vbcast.lane.b32.xlu0 %v2682_v48, 264  ;;  %2684 = vbcast.lane.b32.xlu1 %v2682_v48, 256 }
 0x852   : > { %v949_v62 = vadd.f32 %v948_v49, %v947_v57  ;;  %v956_v61 = vadd.f32 %v955_v52, %v954_v58  ;;  %v875_v28 = vpop.permute.xlu1 %874  ;;  %v944_v8 = vadd.f32 %v943_v9, %v942_v45  ;;  %v4429_v49 = vld [vmem:[%s3757_s29 + $0x58] sm:$0xff]  ;;  %v4442_v9 = vpop.permute.xlu0 %2072 }
 0x853   : > { %v927_v16 = vmul.f32 %v4401_v56, %v875_v28  ;;  %v4437_v28 = vld [vmem:[%s3757_s29 + $0x60] sm:$0xff] }
 0x854   : > { %v950_v5 = vrot.slane %v949_v62, 2  ;;  %v957_v21 = vrot.slane %v956_v61, 4 }
 0x855   : > { %v964_v6 = vsel %vm578_vm1, %v927_v16, 0.0  ;;  %2699 = vbcast.lane.b32.xlu0 %v2693_v15, 264  ;;  %2695 = vbcast.lane.b32.xlu1 %v2693_v15, 256  ;;  %v932_v16 = vmul.f32 %v4437_v28, %v4340_v0 }
 0x856   : > { %v951_v12 = vadd.f32 %v950_v5, %v949_v62  ;;  %v958_v14 = vadd.f32 %v957_v21, %v956_v61  ;;  %v965_v19 = vadd.f32 %v964_v6, %v963_v13  ;;  %v886_v17 = vpop.permute.xlu1 %885  ;;  %v981_v61 = vsel %vm578_vm1, %v930_v3, 0.0  ;;  %v4445_v6 = vld [vmem:[%s3757_s29 + $0x68] sm:$0xff] }
 0x857   : > { %v929_v44 = vmul.f32 %v4414_v37, %v886_v17 }
 0x858   : > { %v952_v41 = vrot.slane %v951_v12, 1  ;;  %v959_v59 = vrot.slane %v958_v14, 2  ;;  %v966_v27 = vrot.slane %v965_v19, 4 }
 0x859   : > { %v973_v42 = vsel %vm578_vm1, %v929_v44, 0.0  ;;  %2710 = vbcast.lane.b32.xlu0 %v2704_v20, 264  ;;  %2706 = vbcast.lane.b32.xlu1 %v2704_v20, 256  ;;  %v990_v20 = vsel %vm578_vm1, %v932_v16, 0.0 }
 0x85a   : > { %v953_v63 = vadd.f32 %v952_v41, %v951_v12  ;;  %v960_v57 = vadd.f32 %v959_v59, %v958_v14  ;;  %v967_v32 = vadd.f32 %v966_v27, %v965_v19  ;;  %v974_v47 = vadd.f32 %v973_v42, %v972_v31  ;;  %v897_v48 = vpop.permute.xlu1 %896  ;;  %v4453_v41 = vld [vmem:[%s3757_s29 + $0x70] sm:$0xff] }
 0x85b   : > { %v931_v58 = vmul.f32 %v4429_v49, %v897_v48  ;;  %v2726_v14 = vrot.slane %v4377_v39, %v4270_v51  ;;  %v934_v59 = vmul.f32 %v4453_v41, %v4342_v34 }
 0x85c   : > { %v1016_v50 = vsel %vm719_vm3, %v953_v63, %v944_v8  ;;  %v961_v45 = vrot.slane %v960_v57, 1  ;;  %v968_v52 = vrot.slane %v967_v32, 2  ;;  %v975_v62 = vrot.slane %v974_v47, 4  ;;  %v4459_v63 = vld [vmem:[%s3757_s29 + $0x78] sm:$0xff]  ;;  %s2999_s29 = sadd.s32 %s3564_s25, %s3247_s30  ;;  %s3583_s30 = smov [#allocation5]  }
 0x85d   : > { %v982_v15 = vsel %vm578_vm1, %v931_v58, 0.0  ;;  %2721 = vbcast.lane.b32.xlu0 %v2715_v60, 264  ;;  %2717 = vbcast.lane.b32.xlu1 %v2715_v60, 256  ;;  %v999_v60 = vsel %vm578_vm1, %v934_v59, 0.0  ;;  %s3248_s14 = sshll.u32 %s2999_s29, 7 }
 0x85e   : > { %v962_v5 = vadd.f32 %v961_v45, %v960_v57  ;;  %v969_v22 = vadd.f32 %v968_v52, %v967_v32  ;;  %v976_v21 = vadd.f32 %v975_v62, %v974_v47  ;;  %v983_v13 = vadd.f32 %v982_v15, %v981_v61  ;;  %v908_v53 = vpop.permute.xlu1 %907  ;;  %s4616_s13 = scalar_lea.hbm %s4708_s6, %s3248_s14 }
 0x85f   : > { %v933_v12 = vmul.f32 %v4445_v6, %v908_v53  ;;  %v2737_v32 = vrot.slane %v4377_v39, %v4276_v29  ;;  %v2748_v29 = vrot.slane %v4377_v39, %v4281_v4 }
 0x860   : > { %v1017_v0 = vsel %vm721_vm4, %v962_v5, %v1016_v50  ;;  %v970_v19 = vrot.slane %v969_v22, 1  ;;  %v977_v17 = vrot.slane %v976_v21, 2  ;;  %v984_v44 = vrot.slane %v983_v13, 4  ;;  %v4466_v50 = vpop.permute.xlu0 %2083 }
 0x861   : > { %v991_v27 = vsel %vm578_vm1, %v933_v12, 0.0  ;;  %2728 = vbcast.lane.b32.xlu0 %v2726_v14, 256  ;;  %2732 = vbcast.lane.b32.xlu1 %v2726_v14, 264 }
 0x862   : > { %v971_v31 = vadd.f32 %v970_v19, %v969_v22  ;;  %v978_v3 = vadd.f32 %v977_v17, %v976_v21  ;;  %v985_v51 = vadd.f32 %v984_v44, %v983_v13  ;;  %v992_v8 = vadd.f32 %v991_v27, %v990_v20  ;;  %v919_v42 = vpop.permute.xlu1 %918 }
 0x863   : > { %v935_v57 = vmul.f32 %v4459_v63, %v919_v42  ;;  %v2759_v17 = vrot.slane %v4377_v39, %v4286_v24 }
 0x864   : > { %v1018_v47 = vsel %vm723_vm5, %v971_v31, %v1017_v0  ;;  %v979_v48 = vrot.slane %v978_v3, 1  ;;  %v986_v34 = vrot.slane %v985_v51, 2  ;;  %v993_v58 = vrot.slane %v992_v8, 4  ;;  %v2095_v19 = vpop.permute.xlu0 %2094 }
 0x865   : > { %v1000_v45 = vsel %vm578_vm1, %v935_v57, 0.0  ;;  %2739 = vbcast.lane.b32.xlu0 %v2737_v32, 256  ;;  %2743 = vbcast.lane.b32.xlu1 %v2737_v32, 264 }
 0x866   : > { %v980_v52 = vadd.f32 %v979_v48, %v978_v3  ;;  %v987_v62 = vadd.f32 %v986_v34, %v985_v51  ;;  %v994_v61 = vadd.f32 %v993_v58, %v992_v8  ;;  %v1001_v16 = vadd.f32 %v1000_v45, %v999_v60  ;;  %v1457_v15 = vpop.permute.xlu1 %1456 }
 0x867   : > { %v1536_v39 = vmul.f32 %v4355_v11, %v1457_v15  ;;  %v1535_v34 = vmul.f32 %v4349_v54, %v4344_v25  ;;  %v1537_v45 = vmul.f32 %v4363_v43, %v4346_v2 }
 0x868   : > { %v988_v5 = vrot.slane %v987_v62, 1  ;;  %v995_v22 = vrot.slane %v994_v61, 2  ;;  %v1002_v21 = vrot.slane %v1001_v16, 4  ;;  %v1019_v13 = vsel %vm725_vm6, %v980_v52, %v1018_v47  ;;  %v2106_v8 = vpop.permute.xlu0 %2105 }
 0x869   : > { %2750 = vbcast.lane.b32.xlu0 %v2748_v29, 256  ;;  %2754 = vbcast.lane.b32.xlu1 %v2748_v29, 264  ;;  %v1551_v15 = vsel %vm578_vm1, %v1535_v34, 0.0 }
 0x86a   : > { %v989_v53 = vadd.f32 %v988_v5, %v987_v62  ;;  %v996_v12 = vadd.f32 %v995_v22, %v994_v61  ;;  %v1003_v14 = vadd.f32 %v1002_v21, %v1001_v16  ;;  %v1468_v0 = vpop.permute.xlu1 %1467  ;;  %v1552_v62 = vsel %vm578_vm1, %v1536_v39, 0.0 }
 0x86b   : > { %v1538_v58 = vmul.f32 %v4367_v30, %v1468_v0  ;;  %v1539_v61 = vmul.f32 %v4371_v36, %v4352_v10  ;;  %v1553_v5 = vadd.f32 %v1552_v62, %v1551_v15  ;;  %v1560_v22 = vsel %vm578_vm1, %v1537_v45, 0.0 }
 0x86c   : > { %v997_v44 = vrot.slane %v996_v12, 1  ;;  %v1004_v20 = vrot.slane %v1003_v14, 2  ;;  %v1020_v59 = vsel %vm727_vm7, %v989_v53, %v1019_v13  ;;  %v2117_v24 = vpop.permute.xlu0 %2116  ;;  %v1541_v13 = vmul.f32 %v4394_v46, %v4360_v18 }
 0x86d   : > { %2761 = vbcast.lane.b32.xlu0 %v2759_v17, 256  ;;  %2765 = vbcast.lane.b32.xlu1 %v2759_v17, 264  ;;  %v1561_v29 = vsel %vm578_vm1, %v1538_v58, 0.0  ;;  %v1569_v2 = vsel %vm578_vm1, %v1539_v61, 0.0  ;;  %v1543_v17 = vmul.f32 %v4408_v7, %v4374_v38  ;;  %v2154_v38 = vmul.f32 %v4367_v30, %v4466_v50 }
 0x86e   : > { %v998_v4 = vadd.f32 %v997_v44, %v996_v12  ;;  %v1005_v27 = vadd.f32 %v1004_v20, %v1003_v14  ;;  %v1479_v31 = vpop.permute.xlu1 %1478  ;;  %v1562_v53 = vadd.f32 %v1561_v29, %v1560_v22  ;;  %v1545_v44 = vmul.f32 %v4421_v26, %v4398_v55 }
 0x86f   : > { %v1540_v60 = vmul.f32 %v4385_v35, %v1479_v31  ;;  %v1554_v20 = vrot.slane %v1553_v5, 4  ;;  %v2156_v55 = vmul.f32 %v4385_v35, %v2095_v19  ;;  %v2177_v29 = vsel %vm578_vm1, %v2154_v38, 0.0 }
 0x870   : > { %v1006_v3 = vrot.slane %v1005_v27, 1  ;;  %v1021_v51 = vsel %vm729_vm8, %v998_v4, %v1020_v59  ;;  %v2124_v52 = vpop.permute.xlu0 %2123  ;;  %v1547_v59 = vmul.f32 %v4437_v28, %v4425_v40  ;;  %v2152_v4 = vmul.f32 %v4355_v11, %v4442_v9 }
 0x871   : > { %v1570_v25 = vsel %vm578_vm1, %v1540_v60, 0.0  ;;  %v1563_v31 = vrot.slane %v1562_v53, 4  ;;  %v1587_v40 = vsel %vm578_vm1, %v1543_v17, 0.0  ;;  %v1596_v9 = vsel %vm578_vm1, %v1545_v44, 0.0 }
 0x872   : > { %v1007_v42 = vadd.f32 %v1006_v3, %v1005_v27  ;;  %v1490_v57 = vpop.permute.xlu1 %1489  ;;  %v1571_v14 = vadd.f32 %v1570_v25, %v1569_v2  ;;  %v1578_v27 = vsel %vm578_vm1, %v1541_v13, 0.0  ;;  %v1605_v34 = vsel %vm578_vm1, %v1547_v59, 0.0 }
 0x873   : > { %v1542_v21 = vmul.f32 %v4401_v56, %v1490_v57  ;;  %v2168_v58 = vsel %vm578_vm1, %v2152_v4, 0.0  ;;  %v2160_v60 = vmul.f32 %v4414_v37, %v2117_v24  ;;  %v1564_v45 = vadd.f32 %v1563_v31, %v1562_v53 }
 0x874   : > { %v4477_v32 = vsel %vm731_vm9, %v1007_v42, %v1021_v51  ;;  %v1530_v10 = vpop.permute.xlu0 %1529  ;;  %v1572_v42 = vrot.slane %v1571_v14, 4  ;;  %v2161_v25 = vmul.f32 %v4421_v26, %v2124_v52 }
 0x875   : > { %v1579_v18 = vsel %vm578_vm1, %v1542_v21, 0.0  ;;  %v1549_v53 = vmul.f32 %v4453_v41, %v1530_v10  ;;  %v2204_v17 = vsel %vm578_vm1, %v2160_v60, 0.0  ;;  %v1565_v44 = vrot.slane %v1564_v45, 2 }
 0x876   : > { %v1501_v47 = vpop.permute.xlu1 %1500  ;;  %v1580_v39 = vadd.f32 %v1579_v18, %v1578_v27  ;;  %v1573_v22 = vadd.f32 %v1572_v42, %v1571_v14  ;;  %v2212_v59 = vsel %vm578_vm1, %v2161_v25, 0.0 }
 0x877   : > { %v1544_v0 = vmul.f32 %v4414_v37, %v1501_v47  ;;  %v1555_v47 = vadd.f32 %v1554_v20, %v1553_v5  ;;  %v2186_v5 = vsel %vm578_vm1, %v2156_v55, 0.0  ;;  %v1614_v38 = vsel %vm578_vm1, %v1549_v53, 0.0 }
 0x878   : > { %v2135_v50 = vpop.permute.xlu0 %2134  ;;  %v1581_v2 = vrot.slane %v1580_v39, 4  ;;  %v1574_v18 = vrot.slane %v1573_v22, 2 }
 0x879   : > { %v1588_v57 = vsel %vm578_vm1, %v1544_v0, 0.0  ;;  %v1556_v21 = vrot.slane %v1555_v47, 2 }
 0x87a   : > { %v1512_v48 = vpop.permute.xlu1 %1511  ;;  %v1589_v19 = vadd.f32 %v1588_v57, %v1587_v40  ;;  %v1582_v10 = vadd.f32 %v1581_v2, %v1580_v39 }
 0x87b   : > { %v1546_v3 = vmul.f32 %v4429_v49, %v1512_v48  ;;  %v2158_v48 = vmul.f32 %v4401_v56, %v2106_v8  ;;  %v1557_v31 = vadd.f32 %v1556_v21, %v1555_v47 }
 0x87c   : > { %v1590_v20 = vrot.slane %v1589_v19, 4  ;;  %v2146_v4 = vpop.permute.xlu0 %2145  ;;  %v1583_v21 = vrot.slane %v1582_v10, 2 }
 0x87d   : > { %v1597_v62 = vsel %vm578_vm1, %v1546_v3, 0.0  ;;  %v2195_v13 = vsel %vm578_vm1, %v2158_v48, 0.0  ;;  %v2165_v40 = vmul.f32 %v4453_v41, %v2146_v4  ;;  %v1558_v25 = vrot.slane %v1557_v31, 1 }
 0x87e   : > { %v2069_v16 = vpop.permute.xlu1 %2068  ;;  %v1598_v0 = vadd.f32 %v1597_v62, %v1596_v9  ;;  %v1566_v9 = vadd.f32 %v1565_v44, %v1564_v45  ;;  %v1591_v48 = vadd.f32 %v1590_v20, %v1589_v19  ;;  %v1575_v62 = vadd.f32 %v1574_v18, %v1573_v22 }
 0x87f   : > { %v2151_v8 = vmul.f32 %v4349_v54, %v2069_v16  ;;  %v2163_v16 = vmul.f32 %v4437_v28, %v2135_v50  ;;  %v4544_v45 = vsel %vm578_vm1, %v2165_v40, 0.0 }
 0x880   : > { %v1599_v55 = vrot.slane %v1598_v0, 4  ;;  %v1567_v19 = vrot.slane %v1566_v9, 1 }
 0x881   : > { %v2167_v3 = vsel %vm578_vm1, %v2151_v8, 0.0 }
 0x882   : > { %v2080_v12 = vpop.permute.xlu1 %2079  ;;  %v2169_v47 = vadd.f32 %v2168_v58, %v2167_v3  ;;  %v1568_v3 = vadd.f32 %v1567_v19, %v1566_v9 }
 0x883   : > { %v2153_v61 = vmul.f32 %v4363_v43, %v2080_v12 }
 0x884   : > { %v2170_v44 = vrot.slane %v2169_v47, 4 }
 0x885   : > { %v2176_v52 = vsel %vm578_vm1, %v2153_v61, 0.0 }
 0x886   : > { %v2091_v51 = vpop.permute.xlu1 %2090  ;;  %v2178_v42 = vadd.f32 %v2177_v29, %v2176_v52  ;;  %v1600_v29 = vadd.f32 %v1599_v55, %v1598_v0 }
 0x887   : > { %v2155_v24 = vmul.f32 %v4371_v36, %v2091_v51 }
 0x888   : > { %v2179_v8 = vrot.slane %v2178_v42, 4  ;;  %v1601_v4 = vrot.slane %v1600_v29, 2 }
 0x889   : > { %v2185_v51 = vsel %vm578_vm1, %v2155_v24, 0.0 }
 0x88a   : > { %v2102_v15 = vpop.permute.xlu1 %2101  ;;  %v2187_v39 = vadd.f32 %v2186_v5, %v2185_v51  ;;  %v1576_v5 = vrot.slane %v1575_v62, 1 }
 0x88b   : > { %v2157_v12 = vmul.f32 %v4394_v46, %v2102_v15  ;;  %v2221_v15 = vsel %vm578_vm1, %v2163_v16, 0.0  ;;  %v1584_v16 = vadd.f32 %v1583_v21, %v1582_v10  ;;  %v1602_v21 = vadd.f32 %v1601_v4, %v1600_v29 }
 0x88c   : > { %v2188_v20 = vrot.slane %v2187_v39, 4  ;;  %v1577_v40 = vadd.f32 %v1576_v5, %v1575_v62 }
 0x88d   : > { %v2194_v57 = vsel %vm578_vm1, %v2157_v12, 0.0  ;;  %v1592_v12 = vrot.slane %v1591_v48, 2 }
 0x88e   : > { %v2113_v14 = vpop.permute.xlu1 %2112  ;;  %v2196_v2 = vadd.f32 %v2195_v13, %v2194_v57 }
 0x88f   : > { %v2159_v27 = vmul.f32 %v4408_v7, %v2113_v14  ;;  %v1559_v14 = vadd.f32 %v1558_v25, %v1557_v31  ;;  %v1593_v51 = vadd.f32 %v1592_v12, %v1591_v48 }
 0x890   : > { %v2197_v13 = vrot.slane %v2196_v2, 4 }
 0x891   : > { %v2203_v60 = vsel %vm578_vm1, %v2159_v27, 0.0  ;;  %v1631_v9 = vsel %vm719_vm3, %v1568_v3, %v1559_v14  ;;  %v1594_v48 = vrot.slane %v1593_v51, 1 }
 0x892   : > { %v1523_v50 = vpop.permute.xlu1 %1522  ;;  %v2205_v24 = vadd.f32 %v2204_v17, %v2203_v60  ;;  %v2180_v17 = vadd.f32 %v2179_v8, %v2178_v42  ;;  %v2171_v60 = vadd.f32 %v2170_v44, %v2169_v47  ;;  %v2198_v31 = vadd.f32 %v2197_v13, %v2196_v2 }
 0x893   : > { %v1548_v61 = vmul.f32 %v4445_v6, %v1523_v50  ;;  %v2189_v50 = vadd.f32 %v2188_v20, %v2187_v39  ;;  %v1632_v2 = vsel %vm721_vm4, %v1577_v40, %v1631_v9  ;;  %v1603_v20 = vrot.slane %v1602_v21, 1 }
 0x894   : > { %v2206_v18 = vrot.slane %v2205_v24, 4  ;;  %v2172_v62 = vrot.slane %v2171_v60, 2  ;;  %v2199_v44 = vrot.slane %v2198_v31, 2  ;;  %v1595_v14 = vadd.f32 %v1594_v48, %v1593_v51 }
 0x895   : > { %v1606_v53 = vsel %vm578_vm1, %v1548_v61, 0.0  ;;  %v2190_v47 = vrot.slane %v2189_v50, 2 }
 0x896   : > { %v1607_v22 = vadd.f32 %v1606_v53, %v1605_v34  ;;  %v2128_v58 = vpop.permute.xlu1 %2127  ;;  %v1585_v53 = vrot.slane %v1584_v16, 1  ;;  %v2207_v42 = vadd.f32 %v2206_v18, %v2205_v24 }
 0x897   : > { %v2162_v52 = vmul.f32 %v4429_v49, %v2128_v58  ;;  %v2181_v58 = vrot.slane %v2180_v17, 2  ;;  %v2191_v3 = vadd.f32 %v2190_v47, %v2189_v50 }
 0x898   : > { %v1608_v0 = vrot.slane %v1607_v22, 4  ;;  %v1586_v5 = vadd.f32 %v1585_v53, %v1584_v16  ;;  %v2200_v16 = vadd.f32 %v2199_v44, %v2198_v31  ;;  %v1604_v53 = vadd.f32 %v1603_v20, %v1602_v21 }
 0x899   : > { %v2213_v27 = vsel %vm578_vm1, %v2162_v52, 0.0  ;;  %v2182_v24 = vadd.f32 %v2181_v58, %v2180_v17  ;;  %v2208_v52 = vrot.slane %v2207_v42, 2  ;;  %v2192_v9 = vrot.slane %v2191_v3, 1 }
 0x89a   : > { %v1609_v55 = vadd.f32 %v1608_v0, %v1607_v22  ;;  %v2214_v57 = vadd.f32 %v2213_v27, %v2212_v59  ;;  %v1534_v34 = vpop.permute.xlu1 %1533  ;;  %v2173_v27 = vadd.f32 %v2172_v62, %v2171_v60 }
 0x89b   : > { %v1550_v61 = vmul.f32 %v4459_v63, %v1534_v34  ;;  %v1633_v34 = vsel %vm723_vm5, %v1586_v5, %v1632_v2  ;;  %v2183_v17 = vrot.slane %v2182_v24, 1 }
 0x89c   : > { %v1610_v10 = vrot.slane %v1609_v55, 2  ;;  %v2215_v25 = vrot.slane %v2214_v57, 4  ;;  %v1634_v60 = vsel %vm725_vm6, %v1595_v14, %v1633_v34  ;;  %v2174_v50 = vrot.slane %v2173_v27, 1 }
 0x89d   : > { %v1615_v8 = vsel %vm578_vm1, %v1550_v61, 0.0  ;;  %v2184_v47 = vadd.f32 %v2183_v17, %v2182_v24 }
 0x89e   : > { %v2216_v19 = vadd.f32 %v2215_v25, %v2214_v57  ;;  %v1616_v59 = vadd.f32 %v1615_v8, %v1614_v38  ;;  %v2139_v12 = vpop.permute.xlu1 %2138  ;;  %v1611_v39 = vadd.f32 %v1610_v10, %v1609_v55  ;;  %v2209_v10 = vadd.f32 %v2208_v52, %v2207_v42 }
 0x89f   : > { %v2164_v22 = vmul.f32 %v4445_v6, %v2139_v12  ;;  %v1635_v42 = vsel %vm727_vm7, %v1604_v53, %v1634_v60  ;;  %v2175_v44 = vadd.f32 %v2174_v50, %v2173_v27 }
 0x8a0   : > { %v1617_v29 = vrot.slane %v1616_v59, 4  ;;  %v2217_v0 = vrot.slane %v2216_v19, 2  ;;  %v1612_v55 = vrot.slane %v1611_v39, 1  ;;  %v2210_v21 = vrot.slane %v2209_v10, 1 }
 0x8a1   : > { %v2222_v13 = vsel %vm578_vm1, %v2164_v22, 0.0  ;;  %v2247_v24 = vsel %vm719_vm3, %v2184_v47, %v2175_v44 }
 0x8a2   : > { %v1618_v4 = vadd.f32 %v1617_v29, %v1616_v59  ;;  %v2223_v38 = vadd.f32 %v2222_v13, %v2221_v15  ;;  %v2150_v18 = vpop.permute.xlu1 %2149  ;;  %v2218_v51 = vadd.f32 %v2217_v0, %v2216_v19  ;;  %v1613_v48 = vadd.f32 %v1612_v55, %v1611_v39 }
 0x8a3   : > { %v2166_v57 = vmul.f32 %v4459_v63, %v2150_v18  ;;  %v2201_v59 = vrot.slane %v2200_v16, 1  ;;  %v2193_v29 = vadd.f32 %v2192_v9, %v2191_v3  ;;  %v2211_v14 = vadd.f32 %v2210_v21, %v2209_v10 }
 0x8a4   : > { %v1619_v40 = vrot.slane %v1618_v4, 2  ;;  %v2224_v61 = vrot.slane %v2223_v38, 4  ;;  %v2219_v22 = vrot.slane %v2218_v51, 1 }
 0x8a5   : > { %v2231_v25 = vsel %vm578_vm1, %v2166_v57, 0.0  ;;  %v2202_v20 = vadd.f32 %v2201_v59, %v2200_v16  ;;  %v2248_v18 = vsel %vm721_vm4, %v2193_v29, %v2247_v24 }
 0x8a6   : > { %v1620_v58 = vadd.f32 %v1619_v40, %v1618_v4  ;;  %v2225_v8 = vadd.f32 %v2224_v61, %v2223_v38  ;;  %v2232_v15 = vadd.f32 %v2231_v25, %v4544_v45  ;;  %v1636_v45 = vsel %vm729_vm8, %v1613_v48, %v1635_v42 }
 0x8a7   : > { %v2220_v4 = vadd.f32 %v2219_v22, %v2218_v51  ;;  %v2249_v27 = vsel %vm723_vm5, %v2202_v20, %v2248_v18 }
 0x8a8   : > { %v1621_v12 = vrot.slane %v1620_v58, 1  ;;  %v2226_v31 = vrot.slane %v2225_v8, 2  ;;  %v2233_v62 = vrot.slane %v2232_v15, 4  ;;  %v2250_v57 = vsel %vm725_vm6, %v2211_v14, %v2249_v27 }
 0x8a9   : > { %v2251_v16 = vsel %vm727_vm7, %v2220_v4, %v2250_v57 }
 0x8aa   : > { %v1622_v2 = vadd.f32 %v1621_v12, %v1620_v58  ;;  %v2227_v19 = vadd.f32 %v2226_v31, %v2225_v8  ;;  %v2234_v5 = vadd.f32 %v2233_v62, %v2232_v15 }
 0x8ac   : > { %v2228_v52 = vrot.slane %v2227_v19, 1  ;;  %v2235_v13 = vrot.slane %v2234_v5, 2  ;;  %v1637_v39 = vsel %vm731_vm9, %v1622_v2, %v1636_v45 }
 0x8ad   : > { %v1709_v0 = vadd.f32 %v4129_v33, %v1637_v39 }
 0x8ae   : > { %v2236_v38 = vadd.f32 %v2235_v13, %v2234_v5  ;;  %v2229_v55 = vadd.f32 %v2228_v52, %v2227_v19 }
 0x8af   : > { %2947 = vrot.lane.b32.xlu0 %v1709_v0, %s4709_s15  ;;  %s3458_s15 = sshll.u32 %s3583_s30, 4  ;;  %s3459_s15 = int_to_ptr.vmem [resolvable:$false] %s3458_s15 }
 0x8b0   : > { %v2237_v3 = vrot.slane %v2236_v38, 1  ;;  %v2252_v33 = vsel %vm729_vm8, %v2229_v55, %v2251_v16  ;;  %s3460_s0 = scalar_lea.vmem %s3459_s15, 1024  ;;  %p3461_p6 = scmp.lt.s32.totalorder %s4605_s19, %s3459_s15 }
 0x8b2   : > { %v2238_v34 = vadd.f32 %v2237_v3, %v2236_v38 }
 0x8b4   : > { %v2253_v40 = vsel %vm731_vm9, %v2238_v34, %v2252_v33 }
 0x8b5   : > { %v2325_v61 = vadd.f32 %v4241_v1, %v2253_v40 }
 0x8b7   : > { %2951 = vrot.lane.b32.xlu1 %v2325_v61, %s3582_s18  ;;  %s3454_s18 = scalar_lea.vmem %s4605_s19, 512 }
 0x8b8   : > { %p3455_p3 = scmp.ne.s32.totalorder %s4605_s19, %s3454_s18  ;;  %p3462_p7 = scmp.lt.s32.totalorder %s3460_s0, %s3454_s18 }
 0x8ba   : > { %p3456_p4 = pnand %p3455_p3, %p3683_p8  ;;  %p3463_p10 = por %p3462_p7, %p3461_p6 }
 0x8bc   : > { %p3457_p5 = pneg %p3456_p4 }
 0x8be   : > { %p3464_p11 = pnand %p3463_p10, %p3457_p5 }
 0x8c3   : > { %v2685_v53 = vpop.permute.xlu1 %2684  ;;  %v2689_v17 = vpop.permute.xlu0 %2688 }
 0x8c4   : > { %v2767_v31 = vmul.f32 %v4349_v54, %v2685_v53  ;;  %v2768_v1 = vmul.f32 %v4355_v11, %v2689_v17 }
 0x8c6   : > { %v2783_v19 = vsel %vm578_vm1, %v2767_v31, 0.0  ;;  %v2784_v5 = vsel %vm578_vm1, %v2768_v1, 0.0 }
 0x8c7   : > { %v2696_v10 = vpop.permute.xlu1 %2695  ;;  %v2700_v25 = vpop.permute.xlu0 %2699  ;;  %v2785_v24 = vadd.f32 %v2784_v5, %v2783_v19 }
 0x8c8   : > { %v2769_v62 = vmul.f32 %v4363_v43, %v2696_v10  ;;  %v2770_v47 = vmul.f32 %v4367_v30, %v2700_v25 }
 0x8c9   : > { %v2786_v34 = vrot.slane %v2785_v24, 4 }
 0x8ca   : > { %v2792_v30 = vsel %vm578_vm1, %v2769_v62, 0.0 }
 0x8cb   : > { %v2707_v51 = vpop.permute.xlu1 %2706  ;;  %v2711_v58 = vpop.permute.xlu0 %2710  ;;  %v2787_v25 = vadd.f32 %v2786_v34, %v2785_v24 }
 0x8cc   : > { %v2771_v21 = vmul.f32 %v4371_v36, %v2707_v51  ;;  %v2772_v42 = vmul.f32 %v4385_v35, %v2711_v58  ;;  %v2793_v36 = vsel %vm578_vm1, %v2770_v47, 0.0 }
 0x8cd   : > { %v2794_v39 = vadd.f32 %v2793_v36, %v2792_v30 }
 0x8ce   : > { %v2802_v29 = vsel %vm578_vm1, %v2772_v42, 0.0 }
 0x8cf   : > { %v2718_v8 = vpop.permute.xlu1 %2717  ;;  %v2722_v15 = vpop.permute.xlu0 %2721  ;;  %v2795_v55 = vrot.slane %v2794_v39, 4 }
 0x8d0   : > { %v2773_v22 = vmul.f32 %v4394_v46, %v2718_v8  ;;  %v2774_v2 = vmul.f32 %v4401_v56, %v2722_v15  ;;  %v2801_v56 = vsel %vm578_vm1, %v2771_v21, 0.0 }
 0x8d1   : > { %v2803_v14 = vadd.f32 %v2802_v29, %v2801_v56  ;;  %v2796_v61 = vadd.f32 %v2795_v55, %v2794_v39 }
 0x8d2   : > { %v2811_v20 = vsel %vm578_vm1, %v2774_v2, 0.0 }
 0x8d3   : > { %v2733_v60 = vpop.permute.xlu1 %2732  ;;  %v2729_v50 = vpop.permute.xlu0 %2728  ;;  %v2804_v3 = vrot.slane %v2803_v14, 4  ;;  %v2797_v15 = vrot.slane %v2796_v61, 2 }
 0x8d4   : > { %v2776_v54 = vmul.f32 %v4414_v37, %v2733_v60  ;;  %v2775_v11 = vmul.f32 %v4408_v7, %v2729_v50  ;;  %v2810_v7 = vsel %vm578_vm1, %v2773_v22, 0.0 }
 0x8d5   : > { %v2805_v17 = vadd.f32 %v2804_v3, %v2803_v14  ;;  %v2798_v1 = vadd.f32 %v2797_v15, %v2796_v61 }
 0x8d7   : > { %v2744_v9 = vpop.permute.xlu1 %2743  ;;  %v2740_v48 = vpop.permute.xlu0 %2739  ;;  %v2806_v50 = vrot.slane %v2805_v17, 2  ;;  %v2799_v5 = vrot.slane %v2798_v1, 1 }
 0x8d8   : > { %v2778_v35 = vmul.f32 %v4429_v49, %v2744_v9  ;;  %v2777_v46 = vmul.f32 %v4421_v26, %v2740_v48  ;;  %v2820_v49 = vsel %vm578_vm1, %v2776_v54, 0.0  ;;  %v2819_v26 = vsel %vm578_vm1, %v2775_v11, 0.0 }
 0x8d9   : > { %v2821_v18 = vadd.f32 %v2820_v49, %v2819_v26  ;;  %v2788_v48 = vrot.slane %v2787_v25, 2  ;;  %v2807_v47 = vadd.f32 %v2806_v50, %v2805_v17 }
 0x8da   : > { %v2829_v0 = vsel %vm578_vm1, %v2778_v35, 0.0 }
 0x8db   : > { %v2755_v59 = vpop.permute.xlu1 %2754  ;;  %v2751_v12 = vpop.permute.xlu0 %2750  ;;  %v2822_v40 = vrot.slane %v2821_v18, 4  ;;  %v2789_v42 = vadd.f32 %v2788_v48, %v2787_v25  ;;  %v2808_v11 = vrot.slane %v2807_v47, 1 }
 0x8dc   : > { %v2780_v45 = vmul.f32 %v4445_v6, %v2755_v59  ;;  %v2779_v37 = vmul.f32 %v4437_v28, %v2751_v12  ;;  %v2828_v6 = vsel %vm578_vm1, %v2777_v46, 0.0  ;;  %v2812_v28 = vadd.f32 %v2811_v20, %v2810_v7 }
 0x8dd   : > { %v2830_v27 = vadd.f32 %v2829_v0, %v2828_v6  ;;  %v2823_v8 = vadd.f32 %v2822_v40, %v2821_v18  ;;  %v2800_v46 = vadd.f32 %v2799_v5, %v2798_v1  ;;  %v2809_v29 = vadd.f32 %v2808_v11, %v2807_v47 }
 0x8de   : > { %v2838_v4 = vsel %vm578_vm1, %v2780_v45, 0.0  ;;  %v2837_v38 = vsel %vm578_vm1, %v2779_v37, 0.0  ;;  %v2813_v16 = vrot.slane %v2812_v28, 4 }
 0x8df   : > { %v2766_v44 = vpop.permute.xlu1 %2765  ;;  %v2762_v43 = vpop.permute.xlu0 %2761  ;;  %v2839_v57 = vadd.f32 %v2838_v4, %v2837_v38  ;;  %v2831_v53 = vrot.slane %v2830_v27, 4  ;;  %v2824_v31 = vrot.slane %v2823_v8, 2 }
 0x8e0   : > { %v2782_v52 = vmul.f32 %v4459_v63, %v2766_v44  ;;  %v2781_v13 = vmul.f32 %v4453_v41, %v2762_v43  ;;  %v2814_v51 = vadd.f32 %v2813_v16, %v2812_v28  ;;  %v2790_v43 = vrot.slane %v2789_v42, 1 }
 0x8e1   : > { %v2840_v10 = vrot.slane %v2839_v57, 4  ;;  %v2832_v60 = vadd.f32 %v2831_v53, %v2830_v27  ;;  %v2825_v19 = vadd.f32 %v2824_v31, %v2823_v8 }
 0x8e2   : > { %v2847_v63 = vsel %vm578_vm1, %v2782_v52, 0.0  ;;  %v2846_v41 = vsel %vm578_vm1, %v2781_v13, 0.0  ;;  %v2815_v59 = vrot.slane %v2814_v51, 2  ;;  %v2791_v37 = vadd.f32 %v2790_v43, %v2789_v42 }
 0x8e3   : > { %v2848_v33 = vadd.f32 %v2847_v63, %v2846_v41  ;;  %v2841_v9 = vadd.f32 %v2840_v10, %v2839_v57  ;;  %v2833_v62 = vrot.slane %v2832_v60, 2  ;;  %v2826_v35 = vrot.slane %v2825_v19, 1 }
 0x8e4   : > { %v2816_v22 = vadd.f32 %v2815_v59, %v2814_v51  ;;  %v2863_v13 = vsel %vm719_vm3, %v2800_v46, %v2791_v37 }
 0x8e5   : > { %v2849_v58 = vrot.slane %v2848_v33, 4  ;;  %v2842_v21 = vrot.slane %v2841_v9, 2  ;;  %v2834_v54 = vadd.f32 %v2833_v62, %v2832_v60  ;;  %v2827_v52 = vadd.f32 %v2826_v35, %v2825_v19 }
 0x8e6   : > { %v2817_v30 = vrot.slane %v2816_v22, 1  ;;  %v2864_v26 = vsel %vm721_vm4, %v2809_v29, %v2863_v13 }
 0x8e7   : > { %v2850_v12 = vadd.f32 %v2849_v58, %v2848_v33  ;;  %v2843_v44 = vadd.f32 %v2842_v21, %v2841_v9  ;;  %v2835_v56 = vrot.slane %v2834_v54, 1 }
 0x8e8   : > { %v2818_v7 = vadd.f32 %v2817_v30, %v2816_v22 }
 0x8e9   : > { %v2851_v2 = vrot.slane %v2850_v12, 2  ;;  %v2844_v45 = vrot.slane %v2843_v44, 1  ;;  %v2836_v39 = vadd.f32 %v2835_v56, %v2834_v54 }
 0x8ea   : > { %v2865_v0 = vsel %vm723_vm5, %v2818_v7, %v2864_v26 }
 0x8eb   : > { %v2852_v36 = vadd.f32 %v2851_v2, %v2850_v12  ;;  %v2845_v49 = vadd.f32 %v2844_v45, %v2843_v44  ;;  %v2866_v6 = vsel %vm725_vm6, %v2827_v52, %v2865_v0 }
 0x8ec   : > { %v2867_v24 = vsel %vm727_vm7, %v2836_v39, %v2866_v6 }
 0x8ed   : > { %v2853_v20 = vrot.slane %v2852_v36, 1 }
 0x8ef   : > { %v2854_v14 = vadd.f32 %v2853_v20, %v2852_v36 }
 0x8f0   : > { %3467 = shalt.err (!%p3464_p11)
}
 0x8f1   : > { %s3468_s29 = scalar_lea.hbm %s4616_s13, 512  ;;  %s3472_s9 = scalar_lea.hbm %s4708_s6, 2048 }
 0x8f2   : > { %p3469_p12 = scmp.ne.s32.totalorder %s4616_s13, %s3468_s29  ;;  %p3473_p1 = scmp.lt.s32.totalorder %s4616_s13, %s4708_s6 }
 0x8f3   : > { %p3474_p2 = scmp.lt.s32.totalorder %s3472_s9, %s3468_s29 }
 0x8f4   : > { %p3470_p13 = pnand %p3469_p12, %p3683_p8 }
 0x8f5   : > { %p3475_p3 = por %p3474_p2, %p3473_p1 }
 0x8f6   : > { %p3471_p0 = pneg %p3470_p13 }
 0x8f8   : > { %p3476_p4 = pnand %p3475_p3, %p3471_p0 }
 0x8fa   : > { %3479 = shalt.err (!%p3476_p4)
}
 0x8fb   : > { %s3584_s0 = smov 128   ;;  %s3585_s15 = smov 256   ;;  %v2868_v28 = vsel %vm729_vm8, %v2845_v49, %v2867_v24  ;;  %v1094_v55 = vadd.f32 %v4014_v23, %v4477_v32  ;;  %vm2960_vm11 = vcmask 195584   ;;  %vm2962_vm12 = vcmask 261120  }
 0x8fc   : > { %s4715_s18 = smov 8   ;;  %s4716_s14 = scalar_lea.sflag [#allocation6], %s3710_s10  ;;  %v2869_v4 = vsel %vm731_vm9, %v2854_v14, %v2868_v28 }
 0x8fd   : > { %3335 = dma.vmem_to_hbm [thread:$0]  (%p3683_p8), %s4605_s19, 512, %s4616_s13, %s4716_s14, %s3584_s0, %s3585_s15, %s4715_s18  }
 0x8fe   : > { %s3586_s17 = smov 24   ;;  %s3199_s29 = sshll.u32 %s3710_s10, 3 }
 0x8ff   : > { %s3245_s20 = sshll.u32 %s3560_s24, 1  ;;  %s414_s13 = scalar_lea.vmem [#allocation3], %s3199_s29 }
 0x900   : > { %s2982_s9 = sadd.s32 %s3564_s25, %s3245_s20  ;;  %s2986_s30 = sshll.u32 %s414_s13, 4  ;;  %s2987_s30 = int_to_ptr.vmem [resolvable:$true] %s2986_s30 }
 0x901   : > { %s3246_s19 = sshll.u32 %s2982_s9, 7  ;;  %s2965_s15 = scalar_lea.sflag [#allocation4], %s3710_s10 }
 0x902   : > { %s4655_s25 = scalar_lea.hbm %s4707_s5, %s3246_s19  ;;  %s3480_s18 = scalar_lea.vmem %s2987_s30, 128 }
 0x903   : > { %p3481_p5 = scmp.ne.s32.totalorder %s2987_s30, %s3480_s18  ;;  %s3587_s14 = smov [#allocation3]  }
 0x905   : > { %p3482_p6 = pnand %p3481_p5, %p3683_p8 }
 0x907   : > { %p3483_p7 = pneg %p3482_p6 }
 0x90f   : > { %v2940_v38 = vpop.f32.mrf.mxu0 }
 0x910   : > { %v2941_v18 = vadd.f32 %v2940_v38, %v2869_v4 }
 0x911   : > { %v3333_v63 = vpop.f32.mrf.mxu0 }
 0x912   : > { %2955 = vrot.lane.b32.xlu0 %v2941_v18, %s3586_s17  ;;  %s3484_s17 = sshll.u32 %s3587_s14, 4  ;;  %s3485_s17 = int_to_ptr.vmem [resolvable:$false] %s3484_s17 }
 0x913   : > { %s3486_s29 = scalar_lea.vmem %s3485_s17, 256  ;;  %p3487_p10 = scmp.lt.s32.totalorder %s2987_s30, %s3485_s17 }
 0x914   : > { %p3488_p11 = scmp.lt.s32.totalorder %s3486_s29, %s3480_s18 }
 0x916   : > { %p3489_p12 = por %p3488_p11, %p3487_p10 }
 0x918   : > { %p3490_p13 = pnand %p3489_p12, %p3483_p7 }
 0x921   : > { %v2948_v41 = vpop.permute.xlu0 %2947 }
 0x922   : > { %v2958_v3 = vsel %vm578_vm1, %v1094_v55, %v2948_v41 }
 0x929   : > { %v2952_v27 = vpop.permute.xlu1 %2951 }
 0x92a   : > { %v2959_v57 = vsel %vm820_vm10, %v2958_v3, %v2952_v27 }
 0x984   : > { %v2956_v34 = vpop.permute.xlu0 %2955 }
 0x985   : > { %v2961_v16 = vsel %vm2960_vm11, %v2959_v57, %v2956_v34 }
 0x986   : > { %2963 = vst.msk [vmem:[%s414_s13] sm:$0xff] %vm2962_vm12, %v2961_v16 }
 0x987   : > { %3493 = shalt.err (!%p3490_p13)
}
 0x988   : > { %s3494_s20 = scalar_lea.hbm %s4655_s25, 128  ;;  %s3498_s19 = scalar_lea.hbm %s4707_s5, 512 }
 0x989   : > { %p3495_p0 = scmp.ne.s32.totalorder %s4655_s25, %s3494_s20  ;;  %p3499_p3 = scmp.lt.s32.totalorder %s4655_s25, %s4707_s5 }
 0x98a   : > { %p3500_p4 = scmp.lt.s32.totalorder %s3498_s19, %s3494_s20 }
 0x98b   : > { %p3496_p1 = pnand %p3495_p0, %p3683_p8 }
 0x98c   : > { %p3501_p5 = por %p3500_p4, %p3499_p3 }
 0x98d   : > { %p3497_p2 = pneg %p3496_p1 }
 0x98f   : > { %p3502_p6 = pnand %p3501_p5, %p3497_p2 }
 0x991   : > { %3505 = shalt.err (!%p3502_p6)
}
 0x992   : > { %3334 = dma.vmem_to_hbm [thread:$0]  (%p3683_p8), %s2987_s30, 128, %s4655_s25, %s2965_s15  }
 0x993 PF: > { %p3345_p7 = scmp.ge.s32.totalorder %s3576_s28, 2  ;;  %s3017_s24 = sand.u32 1, %s3548_s21  }
 0x994   : > { %s3018_s18 = scalar_lea.sflag [#allocation4], %s3017_s24 }
 0x995   : > { %p3339_p10 = pnand %p3345_p7, %p3687_p9 }
 0x997   : > { %p3340_p11 = pneg %p3339_p10 }
 0x999   : > { %3539 = dma.done.wait (%p3340_p11), %s3018_s18, 128  }
 0x99a   : > { %3541 = vsyncadd (%p3340_p11), %s3018_s18, 4294967168  ;;  %s3027_s14 = scalar_lea.sflag [#allocation6], %s3017_s24 }
 0x99b   : > { %3543 = dma.done.wait (%p3340_p11), %s3027_s14, 512  }
 0x99c   : > { %3545 = vsyncadd (%p3340_p11), %s3027_s14, 4294966784  ;;  %s23_s28 = sadd.s32 1, %s3576_s28   ;;  %s4717_s21 = smov %s3552_s22 }
 0x99d   : > { %p20_p12 = scmp.ge.s32.totalorder %s23_s28, 6   ;;  %s4718_s22 = smov %s3556_s23 }
 0x99e   : > { %s4719_s23 = smov %s3695_s16  ;;  %s4720_s24 = smov %s3568_s26 }
 0x99f   : > { %s4721_s25 = smov %s3572_s27  ;;  %s4722_s26 = smov %s4725_s7 }
 0x9a0   : > { %s4723_s27 = smov %s4729_s8  ;;  %22 = sbr.rel (!%p20_p12) target bundleno = 9 (0x9), region = 159 }
 0x9a5   :  { %3032 = vsyncpa [#allocation4], 1 }
 0x9a6   :  { %3034 = vsyncpa [#allocation4 + $0x1], 1 }
 0x9a7   :  { %3035 = vsyncpa [#allocation6], 1 }
 0x9a8   :  { %3037 = vsyncpa [#allocation6 + $0x1], 1 }

</bundles_post_ra>
